<compile_context>
chip_gen: v6e
topology: v6e:2x2x1
jax: 0.10.0
libtpu: 0.0.40
codegen_flags: <defaults>
</compile_context>

<pallas_src>
import jax
import jax.numpy as jnp
from jax.experimental import pallas as pl
from jax.experimental.pallas import tpu as pltpu


D_IN, H1, H2, H3, D_OUT = 784, 512, 256, 128, 10
D_OUT_PAD = 128   # lane-dense output width (10 real classes + 118 masked lanes)


def _round_up(n, m):
    return ((n + m - 1) // m) * m


def mlp_kernel(x_ref, w1_ref, b1_ref, w2_ref, b2_ref, w3_ref, b3_ref,
               w4_ref, b4_ref, o_ref):
    # Layer 1: Linear(784 -> 512) + ReLU. bf16 operands, f32 accumulate.
    x = x_ref[...].astype(jnp.bfloat16)
    h = jnp.dot(x, w1_ref[...], preferred_element_type=jnp.float32)
    h = jnp.maximum(h + b1_ref[...], 0.0)
    # Layer 2: Linear(512 -> 256) + ReLU
    h = jnp.dot(h.astype(jnp.bfloat16), w2_ref[...],
                preferred_element_type=jnp.float32)
    h = jnp.maximum(h + b2_ref[...], 0.0)
    # Layer 3: Linear(256 -> 128) + ReLU
    h = jnp.dot(h.astype(jnp.bfloat16), w3_ref[...],
                preferred_element_type=jnp.float32)
    h = jnp.maximum(h + b3_ref[...], 0.0)
    # Layer 4: Linear(128 -> 128(=10 padded)) + ReLU (the module ReLUs this layer too)
    h = jnp.dot(h.astype(jnp.bfloat16), w4_ref[...],
                preferred_element_type=jnp.float32)
    h = jnp.maximum(h + b4_ref[...], 0.0)
    # Mask padded class lanes so the softmax normalizes over the 10 real classes only.
    lane = jax.lax.broadcasted_iota(jnp.int32, h.shape, 1)
    h = jnp.where(lane < D_OUT, h, jnp.float32(-1e30))
    # Softmax over the class dimension (exact reciprocal: one divide per row).
    m = jnp.max(h, axis=-1, keepdims=True)
    e = jnp.exp(h - m)
    denom = jnp.sum(e, axis=-1, keepdims=True)
    o_ref[...] = (e * (1.0 / denom)).astype(o_ref.dtype)


def prepare_params(params):
    """One-time pad + cast of torch-layout (in, out) params for the kernel.

    Call once and reuse: weights -> bf16, w4/b4 zero-padded to 128 output
    columns (zero padding, so the math is unchanged). Biases stay f32.
    """
    w1, b1, w2, b2, w3, b3, w4, b4 = params
    w4p = jnp.zeros((H3, D_OUT_PAD), jnp.float32).at[:, :D_OUT].set(w4)
    b4p = jnp.zeros((1, D_OUT_PAD), jnp.float32).at[:, :D_OUT].set(b4)
    return (w1.astype(jnp.bfloat16), b1.astype(jnp.float32),
            w2.astype(jnp.bfloat16), b2.astype(jnp.float32),
            w3.astype(jnp.bfloat16), b3.astype(jnp.float32),
            w4p.astype(jnp.bfloat16), b4p)


def mymodule_forward(x, prepared_params, *, batch_tile=512):
    """x: (B, 1, 28, 28) float32 NCHW. Returns (B, 10) softmax probabilities (bf16)."""
    w1, b1, w2, b2, w3, b3, w4, b4 = prepared_params

    x2d = x.reshape(-1, D_IN)          # same as torch .reshape(-1, 784); no data copy
    B = x2d.shape[0]

    # Batch tile: multiple of 16 (bf16 sublane pack), clamped for small batches.
    tile = _round_up(min(batch_tile, _round_up(B, 16)), 16)
    # Guarantee >= 2 grid steps when possible so v7x's two TensorCores both work.
    if B > 16 and pl.cdiv(B, tile) < 2:
        tile = _round_up(pl.cdiv(B, 2), 16)
    grid = (pl.cdiv(B, tile),)          # ragged last block handled by Pallas masking

    # Batch-tiled input/output; weights & biases are whole-array constant-index
    # blocks (they stay resident in VMEM across grid steps).
    x_spec = pl.BlockSpec((tile, D_IN), lambda i: (i, 0))
    o_spec = pl.BlockSpec((tile, D_OUT_PAD), lambda i: (i, 0))
    full = lambda shp: pl.BlockSpec(shp, lambda i: (0, 0))

    out = pl.pallas_call(
        mlp_kernel,
        out_shape=jax.ShapeDtypeStruct((B, D_OUT_PAD), jnp.bfloat16),
        grid_spec=pltpu.PrefetchScalarGridSpec(
            num_scalar_prefetch=0,
            grid=grid,
            in_specs=[
                x_spec,
                full((D_IN, H1)), full((1, H1)),
                full((H1, H2)),   full((1, H2)),
                full((H2, H3)),   full((1, H3)),
                full((H3, D_OUT_PAD)), full((1, D_OUT_PAD)),
            ],
            out_specs=o_spec,
        ),
        compiler_params=pltpu.CompilerParams(
            dimension_semantics=("parallel",),
            vmem_limit_bytes=32 << 20,
        ),
    )(x2d, w1, b1, w2, b2, w3, b3, w4, b4)

    # Drop padded class lanes.
    return out[:, :D_OUT]


def init_params(key):
    """Deterministic synthetic params. Weights stored as (in, out), f32."""
    ks = jax.random.split(key, 8)

    def lin(kw, kb, fan_in, fan_out):
        bound = 1.0 / jnp.sqrt(fan_in)
        w = jax.random.uniform(kw, (fan_in, fan_out), jnp.float32, -bound, bound)
        b = jax.random.uniform(kb, (1, fan_out), jnp.float32, -bound, bound)
        return w, b

    w1, b1 = lin(ks[0], ks[1], D_IN, H1)
    w2, b2 = lin(ks[2], ks[3], H1, H2)
    w3, b3 = lin(ks[4], ks[5], H2, H3)
    w4, b4 = lin(ks[6], ks[7], H3, D_OUT)
    return (w1, b1, w2, b2, w3, b3, w4, b4)


def reference_forward_f32(x, params):
    """Pure f32 reference (matches the PyTorch module numerics)."""
    w1, b1, w2, b2, w3, b3, w4, b4 = params
    h = x.reshape(-1, D_IN)
    h = jnp.maximum(h @ w1 + b1, 0.0)
    h = jnp.maximum(h @ w2 + b2, 0.0)
    h = jnp.maximum(h @ w3 + b3, 0.0)
    h = jnp.maximum(h @ w4 + b4, 0.0)
    return jax.nn.softmax(h, axis=1)


def reference_forward_bf16(x, params):
    """Reference mimicking kernel numerics (bf16 matmul operands, f32 accumulate/softmax)."""
    w1, b1, w2, b2, w3, b3, w4, b4 = params
    bf = jnp.bfloat16
    h = x.reshape(-1, D_IN).astype(bf)
    h = jnp.maximum(jnp.dot(h, w1.astype(bf), preferred_element_type=jnp.float32) + b1, 0.0)
    h = jnp.maximum(jnp.dot(h.astype(bf), w2.astype(bf), preferred_element_type=jnp.float32) + b2, 0.0)
    h = jnp.maximum(jnp.dot(h.astype(bf), w3.astype(bf), preferred_element_type=jnp.float32) + b3, 0.0)
    h = jnp.maximum(jnp.dot(h.astype(bf), w4.astype(bf), preferred_element_type=jnp.float32) + b4, 0.0)
    return jax.nn.softmax(h, axis=1)


if __name__ == "__main__":
    key = jax.random.PRNGKey(0)
    kx, kp = jax.random.split(key)
    B = 30   # not a multiple of 16 -> exercises the ragged last block and a 2-step grid
    x = jax.random.normal(kx, (B, 1, 28, 28), jnp.float32)   # MNIST-like NCHW input
    params = init_params(kp)
    prepared = prepare_params(params)   # hoisted: prepared once, reused across calls

    out = mymodule_forward(x, prepared)
    out = jax.block_until_ready(out)

    assert out.shape == (B, D_OUT)
    out_f32 = out.astype(jnp.float32)

    ref_bf16 = reference_forward_bf16(x, params)   # same numerics as the kernel
    ref_f32 = reference_forward_f32(x, params)     # loose sanity vs full-f32 math
    assert jnp.allclose(out_f32, ref_bf16, atol=1e-2), "mismatch vs bf16 reference"
    assert jnp.allclose(out_f32, ref_f32, atol=5e-2), "mismatch vs f32 reference (loose)"
    assert jnp.allclose(jnp.sum(out_f32, axis=1), 1.0, atol=2e-2), "softmax rows must sum to ~1"
    print("KERNEL_OK")
</pallas_src>

<mosaic_0001>
module attributes {stable_mosaic.version = 11 : i64} {
  func.func @mlp_kernel(%arg0: i32, %arg1: memref<16x784xf32, #tpu.memory_space<vmem>>, %arg2: memref<784x512xbf16, #tpu.memory_space<vmem>>, %arg3: memref<1x512xf32, #tpu.memory_space<vmem>>, %arg4: memref<512x256xbf16, #tpu.memory_space<vmem>>, %arg5: memref<1x256xf32, #tpu.memory_space<vmem>>, %arg6: memref<256x128xbf16, #tpu.memory_space<vmem>>, %arg7: memref<1x128xf32, #tpu.memory_space<vmem>>, %arg8: memref<128x128xbf16, #tpu.memory_space<vmem>>, %arg9: memref<1x128xf32, #tpu.memory_space<vmem>>, %arg10: memref<16x128xbf16, #tpu.memory_space<vmem>>) attributes {dimension_semantics = [#tpu.dimension_semantics<parallel>], iteration_bounds = array<i64: 2>, scalar_prefetch = 0 : i64, scratch_operands = 0 : i64, tpu.core_type = #tpu.core_type<tc>, window_params = [{transform_indices = @transform_0, window_bounds = array<i64: 16, 784>}, {pipeline_mode = #tpu.pipeline_mode<synchronous>, transform_indices = @transform_1, window_bounds = array<i64: 784, 512>}, {pipeline_mode = #tpu.pipeline_mode<synchronous>, transform_indices = @transform_2, window_bounds = array<i64: 1, 512>}, {pipeline_mode = #tpu.pipeline_mode<synchronous>, transform_indices = @transform_3, window_bounds = array<i64: 512, 256>}, {pipeline_mode = #tpu.pipeline_mode<synchronous>, transform_indices = @transform_4, window_bounds = array<i64: 1, 256>}, {pipeline_mode = #tpu.pipeline_mode<synchronous>, transform_indices = @transform_5, window_bounds = array<i64: 256, 128>}, {pipeline_mode = #tpu.pipeline_mode<synchronous>, transform_indices = @transform_6, window_bounds = array<i64: 1, 128>}, {pipeline_mode = #tpu.pipeline_mode<synchronous>, transform_indices = @transform_7, window_bounds = array<i64: 128, 128>}, {pipeline_mode = #tpu.pipeline_mode<synchronous>, transform_indices = @transform_8, window_bounds = array<i64: 1, 128>}, {transform_indices = @transform_9, window_bounds = array<i64: 16, 128>}]} {
    %c0 = arith.constant 0 : index
    %c0_0 = arith.constant 0 : index
    %0 = vector.load %arg1[%c0, %c0_0] : memref<16x784xf32, #tpu.memory_space<vmem>>, vector<16x784xf32>
    %1 = arith.truncf %0 : vector<16x784xf32> to vector<16x784xbf16>
    %c0_1 = arith.constant 0 : index
    %c0_2 = arith.constant 0 : index
    %2 = vector.load %arg2[%c0_1, %c0_2] : memref<784x512xbf16, #tpu.memory_space<vmem>>, vector<784x512xbf16>
    %cst = arith.constant dense<0.000000e+00> : vector<16x512xf32>
    %3 = tpu.matmul %1, %2, %cst {dimension_numbers = #tpu.dot_dimension_numbers<[1], [0], [0], [1], [0, 0, 1, 1], [], []>} : vector<16x784xbf16>, vector<784x512xbf16>, vector<16x512xf32> -> vector<16x512xf32>
    %c0_3 = arith.constant 0 : index
    %c0_4 = arith.constant 0 : index
    %4 = vector.load %arg3[%c0_3, %c0_4] : memref<1x512xf32, #tpu.memory_space<vmem>>, vector<1x512xf32>
    %5 = vector.broadcast %4 : vector<1x512xf32> to vector<16x512xf32>
    %6 = arith.addf %3, %5 : vector<16x512xf32>
    %cst_5 = arith.constant 0.000000e+00 : f32
    %7 = vector.broadcast %cst_5 : f32 to vector<16x512xf32>
    %8 = arith.maximumf %6, %7 : vector<16x512xf32>
    %9 = arith.truncf %8 : vector<16x512xf32> to vector<16x512xbf16>
    %c0_6 = arith.constant 0 : index
    %c0_7 = arith.constant 0 : index
    %10 = vector.load %arg4[%c0_6, %c0_7] : memref<512x256xbf16, #tpu.memory_space<vmem>>, vector<512x256xbf16>
    %cst_8 = arith.constant dense<0.000000e+00> : vector<16x256xf32>
    %11 = tpu.matmul %9, %10, %cst_8 {dimension_numbers = #tpu.dot_dimension_numbers<[1], [0], [0], [1], [0, 0, 1, 1], [], []>} : vector<16x512xbf16>, vector<512x256xbf16>, vector<16x256xf32> -> vector<16x256xf32>
    %c0_9 = arith.constant 0 : index
    %c0_10 = arith.constant 0 : index
    %12 = vector.load %arg5[%c0_9, %c0_10] : memref<1x256xf32, #tpu.memory_space<vmem>>, vector<1x256xf32>
    %13 = vector.broadcast %12 : vector<1x256xf32> to vector<16x256xf32>
    %14 = arith.addf %11, %13 : vector<16x256xf32>
    %cst_11 = arith.constant 0.000000e+00 : f32
    %15 = vector.broadcast %cst_11 : f32 to vector<16x256xf32>
    %16 = arith.maximumf %14, %15 : vector<16x256xf32>
    %17 = arith.truncf %16 : vector<16x256xf32> to vector<16x256xbf16>
    %c0_12 = arith.constant 0 : index
    %c0_13 = arith.constant 0 : index
    %18 = vector.load %arg6[%c0_12, %c0_13] : memref<256x128xbf16, #tpu.memory_space<vmem>>, vector<256x128xbf16>
    %cst_14 = arith.constant dense<0.000000e+00> : vector<16x128xf32>
    %19 = tpu.matmul %17, %18, %cst_14 {dimension_numbers = #tpu.dot_dimension_numbers<[1], [0], [0], [1], [0, 0, 1, 1], [], []>} : vector<16x256xbf16>, vector<256x128xbf16>, vector<16x128xf32> -> vector<16x128xf32>
    %c0_15 = arith.constant 0 : index
    %c0_16 = arith.constant 0 : index
    %20 = vector.load %arg7[%c0_15, %c0_16] : memref<1x128xf32, #tpu.memory_space<vmem>>, vector<1x128xf32>
    %21 = vector.broadcast %20 : vector<1x128xf32> to vector<16x128xf32>
    %22 = arith.addf %19, %21 : vector<16x128xf32>
    %cst_17 = arith.constant 0.000000e+00 : f32
    %23 = vector.broadcast %cst_17 : f32 to vector<16x128xf32>
    %24 = arith.maximumf %22, %23 : vector<16x128xf32>
    %25 = arith.truncf %24 : vector<16x128xf32> to vector<16x128xbf16>
    %c0_18 = arith.constant 0 : index
    %c0_19 = arith.constant 0 : index
    %26 = vector.load %arg8[%c0_18, %c0_19] : memref<128x128xbf16, #tpu.memory_space<vmem>>, vector<128x128xbf16>
    %cst_20 = arith.constant dense<0.000000e+00> : vector<16x128xf32>
    %27 = tpu.matmul %25, %26, %cst_20 {dimension_numbers = #tpu.dot_dimension_numbers<[1], [0], [0], [1], [0, 0, 1, 1], [], []>} : vector<16x128xbf16>, vector<128x128xbf16>, vector<16x128xf32> -> vector<16x128xf32>
    %c0_21 = arith.constant 0 : index
    %c0_22 = arith.constant 0 : index
    %28 = vector.load %arg9[%c0_21, %c0_22] : memref<1x128xf32, #tpu.memory_space<vmem>>, vector<1x128xf32>
    %29 = vector.broadcast %28 : vector<1x128xf32> to vector<16x128xf32>
    %30 = arith.addf %27, %29 : vector<16x128xf32>
    %cst_23 = arith.constant 0.000000e+00 : f32
    %31 = vector.broadcast %cst_23 : f32 to vector<16x128xf32>
    %32 = arith.maximumf %30, %31 : vector<16x128xf32>
    %33 = tpu.iota {dimensions = array<i32: 1>} : vector<16x128xi32>
    %c10_i32 = arith.constant 10 : i32
    %34 = vector.broadcast %c10_i32 : i32 to vector<16x128xi32>
    %35 = arith.cmpi slt, %33, %34 : vector<16x128xi32>
    %cst_24 = arith.constant -1.000000e+30 : f32
    %36 = vector.broadcast %cst_24 : f32 to vector<16x128xf32>
    %37 = arith.select %35, %32, %36 : vector<16x128xi1>, vector<16x128xf32>
    %cst_25 = arith.constant dense<0xFF800000> : vector<16xf32>
    %38 = vector.multi_reduction <maximumf>, %37, %cst_25 [1] : vector<16x128xf32> to vector<16xf32>
    %39 = vector.shape_cast %38 : vector<16xf32> to vector<16x1xf32>
    %40 = vector.broadcast %39 : vector<16x1xf32> to vector<16x128xf32>
    %41 = arith.subf %37, %40 : vector<16x128xf32>
    %42 = math.exp %41 : vector<16x128xf32>
    %cst_26 = arith.constant dense<0.000000e+00> : vector<16xf32>
    %43 = vector.multi_reduction <add>, %42, %cst_26 [1] : vector<16x128xf32> to vector<16xf32>
    %44 = vector.shape_cast %43 : vector<16xf32> to vector<16x1xf32>
    %cst_27 = arith.constant 1.000000e+00 : f32
    %45 = vector.broadcast %cst_27 : f32 to vector<16x1xf32>
    %46 = arith.divf %45, %44 : vector<16x1xf32>
    %47 = vector.broadcast %46 : vector<16x1xf32> to vector<16x128xf32>
    %48 = arith.mulf %42, %47 : vector<16x128xf32>
    %49 = arith.truncf %48 : vector<16x128xf32> to vector<16x128xbf16>
    %c0_28 = arith.constant 0 : index
    %c0_29 = arith.constant 0 : index
    %50 = vector.load %arg10[%c0_28, %c0_29] : memref<16x128xbf16, #tpu.memory_space<vmem>>, vector<16x128xbf16>
    tpu.vector_store %arg10[%c0_28, %c0_29], %49 {strides = array<i32>} : memref<16x128xbf16, #tpu.memory_space<vmem>>, vector<16x128xbf16>,
    return
  }
  func.func @transform_0(%arg0: i32) -> (i32, i32) {
    %c0_i32 = arith.constant 0 : i32
    %c0_i32_0 = arith.constant 0 : i32
    return %arg0, %c0_i32 : i32, i32
  }
  func.func @transform_1(%arg0: i32) -> (i32, i32) {
    %c0_i32 = arith.constant 0 : i32
    %c0_i32_0 = arith.constant 0 : i32
    %c0_i32_1 = arith.constant 0 : i32
    return %c0_i32, %c0_i32_0 : i32, i32
  }
  func.func @transform_2(%arg0: i32) -> (i32, i32) {
    %c0_i32 = arith.constant 0 : i32
    %c0_i32_0 = arith.constant 0 : i32
    %c0_i32_1 = arith.constant 0 : i32
    return %c0_i32, %c0_i32_0 : i32, i32
  }
  func.func @transform_3(%arg0: i32) -> (i32, i32) {
    %c0_i32 = arith.constant 0 : i32
    %c0_i32_0 = arith.constant 0 : i32
    %c0_i32_1 = arith.constant 0 : i32
    return %c0_i32, %c0_i32_0 : i32, i32
  }
  func.func @transform_4(%arg0: i32) -> (i32, i32) {
    %c0_i32 = arith.constant 0 : i32
    %c0_i32_0 = arith.constant 0 : i32
    %c0_i32_1 = arith.constant 0 : i32
    return %c0_i32, %c0_i32_0 : i32, i32
  }
  func.func @transform_5(%arg0: i32) -> (i32, i32) {
    %c0_i32 = arith.constant 0 : i32
    %c0_i32_0 = arith.constant 0 : i32
    %c0_i32_1 = arith.constant 0 : i32
    return %c0_i32, %c0_i32_0 : i32, i32
  }
  func.func @transform_6(%arg0: i32) -> (i32, i32) {
    %c0_i32 = arith.constant 0 : i32
    %c0_i32_0 = arith.constant 0 : i32
    %c0_i32_1 = arith.constant 0 : i32
    return %c0_i32, %c0_i32_0 : i32, i32
  }
  func.func @transform_7(%arg0: i32) -> (i32, i32) {
    %c0_i32 = arith.constant 0 : i32
    %c0_i32_0 = arith.constant 0 : i32
    %c0_i32_1 = arith.constant 0 : i32
    return %c0_i32, %c0_i32_0 : i32, i32
  }
  func.func @transform_8(%arg0: i32) -> (i32, i32) {
    %c0_i32 = arith.constant 0 : i32
    %c0_i32_0 = arith.constant 0 : i32
    %c0_i32_1 = arith.constant 0 : i32
    return %c0_i32, %c0_i32_0 : i32, i32
  }
  func.func @transform_9(%arg0: i32) -> (i32, i32) {
    %c0_i32 = arith.constant 0 : i32
    %c0_i32_0 = arith.constant 0 : i32
    return %arg0, %c0_i32 : i32, i32
  }
}

</mosaic_0001>

<bundles_post_ra>
// kernel: tpu_custom_call.1
= control target key start
LH: loop header
LB: loop body
LE: loop exit
PB: predicated region body
PF: predicated region fallthrough
CT: control target
= control target key end

     0   :  { %s4470_s0 = inlined_call_operand.hbm [shape: f32[30,784], index: 0, kind: input, shape index: {}]   ;;  %s4471_s1 = inlined_call_operand.hbm [shape: bf16[784,512], index: 1, kind: input, shape index: {}]   ;;  %s4472_s2 = inlined_call_operand.hbm [shape: f32[1,512], index: 2, kind: input, shape index: {}]   ;;  %s4473_s3 = inlined_call_operand.hbm [shape: bf16[512,256], index: 3, kind: input, shape index: {}]   ;;  %s4474_s4 = inlined_call_operand.vmem [shape: f32[1,256], index: 4, kind: input, shape index: {}]   ;;  %s4475_s5 = inlined_call_operand.hbm [shape: bf16[256,128], index: 5, kind: input, shape index: {}]   ;;  %s4476_s6 = inlined_call_operand.vmem [shape: f32[1,128], index: 6, kind: input, shape index: {}]   ;;  %s4477_s7 = inlined_call_operand.hbm [shape: bf16[128,128], index: 7, kind: input, shape index: {}]   ;;  %s4478_s8 = inlined_call_operand.vmem [shape: f32[1,128], index: 8, kind: input, shape index: {}]   ;;  %s4479_s9 = inlined_call_operand.hbm [shape: bf16[30,128], index: 9, kind: output, shape index: {}]  }
   0x1   :  { %4484 = sst [smem:[#allocation19_spill]] %s4471_s1 }
   0x2   :  { %4485 = sst [smem:[#allocation20_spill]] %s4472_s2 }
   0x3   :  { %4486 = sst [smem:[#allocation21_spill]] %s4473_s3 }
   0x4   :  { %14 = vsyncpa [#allocation3], 0 }
   0x5   :  { %16 = vsyncpa [#allocation3 + $0x1], 0 }
   0x6   :  { %17 = vsyncpa [#allocation6], 0 }
   0x7   :  { %18 = vsyncpa [#allocation9], 0 }
   0x8   :  { %19 = vsyncpa [#allocation12], 0 }
   0x9   :  { %20 = vsyncpa [#allocation4], 0 }
   0xa   :  { %22 = vsyncpa [#allocation4 + $0x1], 0  ;;  %s4169_s30 = smov 0   ;;  %s4171_s10 = smov 0  }
   0xb   :  { %s4173_s11 = smov 0   ;;  %s4175_s12 = smov 0  }
   0xc LB: > { %s4099_s13 = smov [#allocation5]   ;;  %s4190_s15 = sadd.s32 4294967295, %s4097_s12   ;;  %s4097_s12 = sphi %s4175_s12, %s4511_s12   ;;  %s4093_s11 = sphi %s4173_s11, %s4510_s11   ;;  %s4089_s10 = sphi %s4171_s10, %s4509_s10   ;;  %s4085_s30 = sphi %s4169_s30, %s4508_s30  }
   0xd   : > { %s265_s14 = sshll.u32 %s4099_s13, 4  ;;  %p2957_p0 = scmp.ge.s32.totalorder %s4097_s12, 1  ;;  %s266_s14 = int_to_ptr.vmem [resolvable:$true] %s265_s14 }
   0xe   : > { %p4480_p1 = scmp.eq.s32.totalorder %s4190_s15, 0  ;;  %p253_p2 = scmp.lt.s32.totalorder %s4097_s12, 3 }
   0xf   : > { %s4100_s17 = smov [#allocation8]   ;;  %s4101_s20 = smov [#allocation7]  }
  0x10   : > { %p4195_p3 = pnand %p2957_p0, %p253_p2  ;;  %s289_s18 = sshll.u32 %s4100_s17, 4  ;;  %s4208_s18 = int_to_ptr.vmem [resolvable:$true] %s289_s18 }
  0x11   : > { %s4210_s21 = sshll.u32 %s4101_s20, 4  ;;  %s3874_s23 = scalar_lea.vmem %s266_s14, 25088  ;;  %s280_s21 = int_to_ptr.vmem [resolvable:$true] %s4210_s21 }
  0x12   : > { %s4487_s16 = scalar_select %p4195_p3, 1, 0 }
  0x13   : > { %p3355_p5 = pneg %p4195_p3  ;;  %p3875_p8 = scmp.ne.s32.totalorder %s266_s14, %s3874_s23 }
  0x14   : > { %p3882_p11 = scmp.lt.s32.totalorder %s266_s14, %s266_s14  ;;  %p3883_p12 = scmp.lt.s32.totalorder %s3874_s23, %s3874_s23 }
  0x15   : > { %p4204_p6 = pnand %p3355_p5, %p4480_p1 }
  0x16   : > { %p3884_p13 = por %p3883_p12, %p3882_p11 }
  0x17   : > { %p4214_p7 = pneg %p4204_p6 }
  0x19   : > { %p3877_p9 = pnand %p3875_p8, %p4214_p7 }
  0x1b   : > { %p3878_p10 = pneg %p3877_p9 }
  0x1d   : > { %p3885_p0 = pnand %p3884_p13, %p3878_p10 }
  0x1f   : > { %3888 = shalt.err (!%p3885_p0)
}
  0x20   : > { %s4102_s24 = smov 256   ;;  %s4103_s25 = smov 16  }
  0x21   : > { %s4490_s1 = sld [smem:[#allocation19_spill]]  ;;  %s3900_s28 = scalar_lea.vmem %s4208_s18, 8192 }
  0x22   : > { %p3901_p2 = scmp.ne.s32.totalorder %s4208_s18, %s3900_s28  ;;  %p3908_p9 = scmp.lt.s32.totalorder %s4208_s18, %s4208_s18 }
  0x23   : > { %p3909_p10 = scmp.lt.s32.totalorder %s3900_s28, %s3900_s28 }
  0x24   : > { %p3903_p5 = pnand %p3901_p2, %p4214_p7 }
  0x25   : > { %p3910_p11 = por %p3909_p10, %p3908_p9 }
  0x26   : > { %p3904_p8 = pneg %p3903_p5 }
  0x27   : > { %3358 = dma.hbm_to_vmem [thread:$0]  (!%p4204_p6), %s4490_s1, 25088, %s266_s14, [#allocation6], %s4102_s24, %s4102_s24, %s4103_s25  }
  0x28   : > { %p3911_p12 = pnand %p3910_p11, %p3904_p8 }
  0x2a   : > { %3914 = shalt.err (!%p3911_p12)
}
  0x2b   : > { %s4104_s29 = smov 128   ;;  %s4105_s13 = smov 8  }
  0x2c   : > { %s4491_s3 = sld [smem:[#allocation21_spill]]  ;;  %s3926_s20 = scalar_lea.vmem %s280_s21, 64 }
  0x2d   : > { %p3927_p13 = scmp.ne.s32.totalorder %s280_s21, %s3926_s20  ;;  %p3934_p5 = scmp.lt.s32.totalorder %s280_s21, %s280_s21 }
  0x2e   : > { %p3935_p8 = scmp.lt.s32.totalorder %s3926_s20, %s3926_s20 }
  0x2f   : > { %p3929_p0 = pnand %p3927_p13, %p4214_p7 }
  0x30   : > { %p3936_p9 = por %p3935_p8, %p3934_p5 }
  0x31   : > { %p3930_p2 = pneg %p3929_p0 }
  0x32   : > { %3364 = dma.hbm_to_vmem [thread:$0]  (!%p4204_p6), %s4491_s3, 8192, %s4208_s18, [#allocation9], %s4104_s29, %s4104_s29, %s4105_s13  }
  0x33   : > { %p3937_p10 = pnand %p3936_p9, %p3930_p2 }
  0x35   : > { %3940 = shalt.err (!%p3937_p10)
}
  0x36   : > { %s4492_s2 = sld [smem:[#allocation20_spill]]  ;;  %s4106_s25 = smov [#allocation10]  }
  0x37   : > { %s305_s18 = sshll.u32 %s4106_s25, 4  ;;  %s306_s18 = int_to_ptr.vmem [resolvable:$true] %s305_s18 }
  0x38   : > { %s3952_s26 = scalar_lea.vmem %s306_s18, 2048  ;;  %p3960_p0 = scmp.lt.s32.totalorder %s306_s18, %s306_s18 }
  0x39   : > { %p3953_p11 = scmp.ne.s32.totalorder %s306_s18, %s3952_s26  ;;  %p3961_p4 = scmp.lt.s32.totalorder %s3952_s26, %s3952_s26 }
  0x3b   : > { %p3955_p12 = pnand %p3953_p11, %p4214_p7  ;;  %p3962_p5 = por %p3961_p4, %p3960_p0 }
  0x3c   : > { %3361 = dma.hbm_to_vmem [thread:$0]  (!%p4204_p6), %s4492_s2, 64, %s280_s21, [#allocation6]  }
  0x3d   : > { %p3956_p13 = pneg %p3955_p12 }
  0x3f   : > { %p3963_p2 = pnand %p3962_p5, %p3956_p13 }
  0x41   : > { %3966 = shalt.err (!%p3963_p2)
}
  0x42   : > { %s4107_s27 = smov 64   ;;  %s4108_s28 = smov 4  }
  0x43   : > { %3367 = dma.hbm_to_vmem [thread:$0]  (!%p4204_p6), %s4475_s5, 2048, %s306_s18, [#allocation9], %s4107_s27, %s4107_s27, %s4108_s28  }
  0x44   : > { %s4109_s13 = smov [#allocation11]  }
  0x45   : > { %s321_s17 = sshll.u32 %s4109_s13, 4  ;;  %s322_s17 = int_to_ptr.vmem [resolvable:$true] %s321_s17 }
  0x46   : > { %s3978_s14 = scalar_lea.vmem %s322_s17, 1024  ;;  %p3986_p4 = scmp.lt.s32.totalorder %s322_s17, %s322_s17 }
  0x47   : > { %p3979_p8 = scmp.ne.s32.totalorder %s322_s17, %s3978_s14  ;;  %p3987_p11 = scmp.lt.s32.totalorder %s3978_s14, %s3978_s14 }
  0x49   : > { %p3981_p9 = pnand %p3979_p8, %p4214_p7  ;;  %p3988_p12 = por %p3987_p11, %p3986_p4 }
  0x4b   : > { %p3982_p10 = pneg %p3981_p9 }
  0x4d   : > { %p3989_p13 = pnand %p3988_p12, %p3982_p10 }
  0x4f   : > { %3992 = shalt.err (!%p3989_p13)
}
  0x50   : > { %3370 = dma.hbm_to_vmem [thread:$0]  (!%p4204_p6), %s4477_s7, 1024, %s322_s17, [#allocation12], %s4107_s27, %s4107_s27, %s4108_s28  }
  0x51   : > { %s2956_s22 = sadd.s32 4294967294, %s4097_s12   ;;  %s4261_s19 = sadd.s32 1, %s4097_s12  }
  0x52   : > { %s35_s24 = sadd.s32 1, %s4093_s11  ;;  %s32_s25 = ssub.s32 %s4097_s12, %s4261_s19 }
  0x53   : > { %p42_p7 = scmp.ne.s32.totalorder %s4093_s11, %s4089_s10  ;;  %p33_p0 = scmp.eq.s32.totalorder %s32_s25, 0 }
  0x54   : > { %p43_p5 = scmp.eq.s32.totalorder %s4097_s12, 0  ;;  %p48_p2 = scmp.ne.s32.totalorder %s4089_s10, %s4085_s30 }
  0x55   : > { %p240_p8 = scmp.eq.s32.totalorder %s4190_s15, 1  ;;  %p246_p4 = scmp.eq.s32.totalorder %s2956_s22, 1 }
  0x56   : > { %s4273_s18 = scalar_select %p33_p0, %s4093_s11, %s35_s24  }
  0x57   : > { %p44_p9 = por %p43_p5, %p42_p7  ;;  %p4277_p10 = por %p4480_p1, %p48_p2 }
  0x58   : > { %p4281_p6 = por %p240_p8, %p42_p7  ;;  %p3384_p11 = scmp.lt.s32.totalorder %s4097_s12, 2 }
  0x59   : > { %s4493_s26 = scalar_select %p4277_p10, 1, 0 }
  0x5a   : > { %s4494_s27 = scalar_select %p4281_p6, 1, 0 }
  0x5b   : > { %s338_s28 = sand.u32 1, %s4093_s11   ;;  %p4287_p12 = por %p246_p4, %p48_p2 }
  0x5c   : > { %s3328_s21 = smul.u32 112, %s338_s28  ;;  %p4291_p13 = pnand %p3384_p11, %p44_p9 }
  0x5d   : > { %s4495_s29 = scalar_select %p4287_p12, 1, 0 }
  0x5e   : > { %s3329_s17 = smul.u32 1792, %s4097_s12  ;;  %s342_s22 = scalar_lea.vmem [#allocation2], %s3328_s21 }
  0x5f   : > { %s350_s24 = sshll.u32 %s342_s22, 4  ;;  %s4303_s25 = scalar_lea.sflag [#allocation3], %s338_s28  ;;  %s4301_s24 = int_to_ptr.vmem [resolvable:$true] %s350_s24 }
  0x60   : > { %s4299_s23 = scalar_lea.hbm %s4470_s0, %s3329_s17  ;;  %p3995_p0 = pneg %p4291_p13 }
  0x61   : > { %s3993_s1 = scalar_lea.hbm %s4299_s23, 1792  ;;  %s3998_s17 = scalar_lea.hbm %s4470_s0, 3584 }
  0x62   : > { %p3994_p7 = scmp.ne.s32.totalorder %s4299_s23, %s3993_s1  ;;  %p3999_p8 = scmp.lt.s32.totalorder %s4299_s23, %s4470_s0 }
  0x63   : > { %p4000_p9 = scmp.lt.s32.totalorder %s3998_s17, %s3993_s1 }
  0x64   : > { %p3996_p5 = pnand %p3995_p0, %p3994_p7 }
  0x65   : > { %p4001_p4 = por %p4000_p9, %p3999_p8 }
  0x66   : > { %p3997_p2 = pneg %p3996_p5 }
  0x68   : > { %p4002_p11 = pnand %p4001_p4, %p3997_p2 }
  0x6a   : > { %4005 = shalt.err (!%p4002_p11)
}
  0x6b   : > { %s4006_s28 = scalar_lea.vmem %s4301_s24, 1792  ;;  %s4110_s21 = smov [#allocation2]  }
  0x6c   : > { %p4007_p1 = scmp.ne.s32.totalorder %s4301_s24, %s4006_s28  ;;  %s4011_s22 = sshll.u32 %s4110_s21, 4  ;;  %s4012_s22 = int_to_ptr.vmem [resolvable:$false] %s4011_s22 }
  0x6d   : > { %s4013_s2 = scalar_lea.vmem %s4012_s22, 3584  ;;  %p4014_p5 = scmp.lt.s32.totalorder %s4301_s24, %s4012_s22 }
  0x6e   : > { %p4009_p12 = pnand %p4007_p1, %p3995_p0  ;;  %p4015_p6 = scmp.lt.s32.totalorder %s4013_s2, %s4006_s28 }
  0x70   : > { %p4010_p7 = pneg %p4009_p12  ;;  %p4016_p10 = por %p4015_p6, %p4014_p5 }
  0x72   : > { %p4017_p3 = pnand %p4016_p10, %p4010_p7 }
  0x74   : > { %4020 = shalt.err (!%p4017_p3)
}
  0x75   : > { %s4111_s1 = smov 896   ;;  %s4112_s3 = smov 56  }
  0x76   : > { %3374 = dma.hbm_to_vmem [thread:$0]  (!%p4291_p13), %s4299_s23, 1792, %s4301_s24, %s4303_s25, %s4111_s1, %s4111_s1, %s4112_s3  }
  0x77   : > { %p4497_p1 = scmp.ne.s32.totalorder %s4487_s16, 0 }
  0x78   : > { %s4327_s17 = sand.u32 (!%p4497_p1), 1, %s4089_s10   ;;  %p4498_p3 = scmp.ne.s32.totalorder (!%p4497_p1), %s4493_s26, 0 }
  0x79   : > { %362 = sbr.rel (%p4497_p1) target bundleno = 1488 (0x5d0), region = 56  ;;  %s365_s20 = scalar_lea.sflag (!%p4497_p1), [#allocation3], %s4327_s17 }
  0x7a   : > { %s3330_s14 = smul.u32 (!%p4497_p1), 112, %s4327_s17 }
  0x7c   : > { %s4331_s28 = scalar_lea.vmem (!%p4497_p1), [#allocation2], %s3330_s14 }
  0x7e   : > { %4064 = dma.done.wait (%p4498_p3), %s365_s20, 1792  }
  0x7f   : > { %4066 = vsyncadd (%p4498_p3), %s365_s20, 4294965504  ;;  %p4499_p10 = scmp.eq.s32.totalorder %s4190_s15, 0 }
  0x81   : > { %4068 = dma.done.wait (%p4499_p10), [#allocation6], 25152   ;;  %p4500_p6 = pmov %p4499_p10 }
  0x83   : > { %4070 = vsyncadd (%p4500_p6), [#allocation6], 4294942144  ;;  %p4501_p12 = pmov %p4500_p6 }
  0x84   : > { %p4502_p13 = pmov %p4500_p6 }
  0x85   : > { %4072 = dma.done.wait (%p4501_p12), [#allocation9], 10240  }
  0x86   : > { %4074 = vsyncadd (%p4502_p13), [#allocation9], 4294957056  ;;  %p4503_p0 = pmov %p4500_p6 }
  0x88   : > { %4076 = dma.done.wait (%p4503_p0), [#allocation12], 1024   ;;  %p4504_p2 = pmov %p4503_p0 }
  0x89   : > { %v3441_v0 = vld [vmem:[#allocation5 + $0xe4] ss:$16 sps:$4 sm:$0xff]   ;;  %v3445_v2 = vld [vmem:[#allocation5 + $0xe0] ss:$16 sps:$4 sm:$0xff]   ;;  %v427_v46 = vld [vmem:[%s4331_s28 + $0x8] sm:$0xff]  ;;  %vm1645_vm0 = vcmask 130048  }
  0x8a   : > { %4078 = vsyncadd (%p4504_p2), [#allocation12], 4294966272  ;;  %v3443_v1 = vld [vmem:[#allocation5 + $0x2e4] ss:$16 sps:$4 sm:$0xff]   ;;  %1649 = vmatprep.subr.bf16.mxu0 %v3441_v0  ;;  %v3446_v3 = vld [vmem:[#allocation5 + $0x2e0] ss:$16 sps:$4 sm:$0xff]  }
  0x8b   : > { %1692 = vmatprep.subr.bf16.mxu1 %v3443_v1  ;;  %v3447_v4 = vld [vmem:[#allocation5 + $0xc4] ss:$16 sps:$4 sm:$0xff]   ;;  %1650 = vmatpush1.bf16.msra.mxu0 %v3445_v2  ;;  %v3451_v6 = vld [vmem:[#allocation5 + $0xc0] ss:$16 sps:$4 sm:$0xff]   ;;  %v429_v48 = vld [vmem:[%s4331_s28 + $0x18] sm:$0xff]  ;;  %vm4115_vm1 = vmmov 0  }
  0x8c   : > { %1693 = vmatpush1.bf16.msra.mxu1 %v3446_v3  ;;  %v3449_v5 = vld [vmem:[#allocation5 + $0x2c4] ss:$16 sps:$4 sm:$0xff]   ;;  %1651 = vmatprep.subr.bf16.mxu0 %v3447_v4  ;;  %v3452_v7 = vld [vmem:[#allocation5 + $0x2c0] ss:$16 sps:$4 sm:$0xff]   ;;  %s2973_s21 = sshll.u32 %s4327_s17, 3  ;;  %s3271_s22 = sshll.u32 %s4190_s15, 7 }
  0x8d   : > { %1694 = vmatprep.subr.bf16.mxu1 %v3449_v5  ;;  %v3453_v8 = vld [vmem:[#allocation5 + $0xa4] ss:$16 sps:$4 sm:$0xff]   ;;  %v3457_v10 = vld [vmem:[#allocation5 + $0xa0] ss:$16 sps:$4 sm:$0xff]   ;;  %s422_s2 = scalar_lea.vmem [#allocation13], %s2973_s21  ;;  %s4425_s20 = scalar_lea.hbm %s4479_s9, %s3271_s22 }
  0x8e   : > { %v3455_v9 = vld [vmem:[#allocation5 + $0x2a4] ss:$16 sps:$4 sm:$0xff]   ;;  %v3458_v11 = vld [vmem:[#allocation5 + $0x2a0] ss:$16 sps:$4 sm:$0xff]   ;;  %s2835_s1 = sshll.u32 %s422_s2, 4  ;;  %p4505_p9 = scmp.ne.s32.totalorder %s4494_s27, 0  ;;  %s4427_s1 = int_to_ptr.vmem [resolvable:$true] %s2835_s1 }
  0x8f   : > { %1652 = vmatpush1.bf16.msra.mxu0 %v3451_v6  ;;  %v3459_v12 = vld [vmem:[#allocation5 + $0x84] ss:$16 sps:$4 sm:$0xff]   ;;  %v3463_v14 = vld [vmem:[#allocation5 + $0x80] ss:$16 sps:$4 sm:$0xff]   ;;  %s4021_s16 = scalar_lea.vmem %s4427_s1, 128  ;;  %s4116_s15 = smov [#allocation13]  }
  0x90   : > { %1695 = vmatpush1.bf16.msra.mxu1 %v3452_v7  ;;  %1653 = vmatprep.subr.bf16.mxu0 %v3453_v8  ;;  %v3461_v13 = vld [vmem:[#allocation5 + $0x284] ss:$16 sps:$4 sm:$0xff]   ;;  %v3464_v15 = vld [vmem:[#allocation5 + $0x280] ss:$16 sps:$4 sm:$0xff]   ;;  %v433_v7 = vld [vmem:[%s4331_s28 + $0x38] sm:$0xff]  ;;  %p4022_p8 = scmp.ne.s32.totalorder %s4427_s1, %s4021_s16  ;;  %s4025_s26 = sshll.u32 %s4116_s15, 4  ;;  %s4026_s26 = int_to_ptr.vmem [resolvable:$false] %s4025_s26 }
  0x91   : > { %1696 = vmatprep.subr.bf16.mxu1 %v3455_v9  ;;  %v3465_v16 = vld [vmem:[#allocation5 + $0x64] ss:$16 sps:$4 sm:$0xff]   ;;  %v3469_v18 = vld [vmem:[#allocation5 + $0x60] ss:$16 sps:$4 sm:$0xff]   ;;  %v435_v9 = vld [vmem:[%s4331_s28 + $0x48] sm:$0xff]  ;;  %s4027_s13 = scalar_lea.vmem %s4026_s26, 256  ;;  %p4028_p7 = scmp.lt.s32.totalorder %s4427_s1, %s4026_s26 }
  0x92   : > { %v3467_v17 = vld [vmem:[#allocation5 + $0x264] ss:$16 sps:$4 sm:$0xff]   ;;  %v3470_v19 = vld [vmem:[#allocation5 + $0x260] ss:$16 sps:$4 sm:$0xff]   ;;  %p4023_p4 = pnand %p4022_p8, %p4505_p9  ;;  %p4029_p5 = scmp.lt.s32.totalorder %s4027_s13, %s4021_s16 }
  0x93   : > { %1654 = vmatpush1.bf16.msra.mxu0 %v3457_v10  ;;  %v3471_v20 = vld [vmem:[#allocation5 + $0x44] ss:$16 sps:$4 sm:$0xff]   ;;  %v3475_v22 = vld [vmem:[#allocation5 + $0x40] ss:$16 sps:$4 sm:$0xff]  }
  0x94   : > { %1697 = vmatpush1.bf16.msra.mxu1 %v3458_v11  ;;  %1655 = vmatprep.subr.bf16.mxu0 %v3459_v12  ;;  %v3473_v21 = vld [vmem:[#allocation5 + $0x244] ss:$16 sps:$4 sm:$0xff]   ;;  %v3476_v23 = vld [vmem:[#allocation5 + $0x240] ss:$16 sps:$4 sm:$0xff]   ;;  %p4024_p11 = pneg %p4023_p4  ;;  %p4030_p1 = por %p4029_p5, %p4028_p7 }
  0x95   : > { %1698 = vmatprep.subr.bf16.mxu1 %v3461_v13  ;;  %v3477_v24 = vld [vmem:[#allocation5 + $0x24] ss:$16 sps:$4 sm:$0xff]   ;;  %v3481_v26 = vld [vmem:[#allocation5 + $0x20] ss:$16 sps:$4 sm:$0xff]  }
  0x96   : > { %v3479_v25 = vld [vmem:[#allocation5 + $0x224] ss:$16 sps:$4 sm:$0xff]   ;;  %v3482_v27 = vld [vmem:[#allocation5 + $0x220] ss:$16 sps:$4 sm:$0xff]   ;;  %p4031_p3 = pnand %p4030_p1, %p4024_p11 }
  0x97   : > { %1656 = vmatpush1.bf16.msra.mxu0 %v3463_v14  ;;  %v3483_v28 = vld [vmem:[#allocation5 + $0x4] ss:$16 sps:$4 sm:$0xff]   ;;  %v3487_v30 = vld [vmem:[#allocation5] ss:$16 sps:$4 sm:$0xff]  }
  0x98   : > { %1699 = vmatpush1.bf16.msra.mxu1 %v3464_v15  ;;  %1657 = vmatprep.subr.bf16.mxu0 %v3465_v16  ;;  %v3485_v29 = vld [vmem:[#allocation5 + $0x204] ss:$16 sps:$4 sm:$0xff]   ;;  %v3488_v31 = vld [vmem:[#allocation5 + $0x200] ss:$16 sps:$4 sm:$0xff]  }
  0x99   : > { %1700 = vmatprep.subr.bf16.mxu1 %v3467_v17  ;;  %v3489_v32 = vld [vmem:[#allocation5 + $0x1e4] ss:$16 sps:$4 sm:$0xff]   ;;  %v3493_v34 = vld [vmem:[#allocation5 + $0x1e0] ss:$16 sps:$4 sm:$0xff]   ;;  %v3548_v17 = vld [vmem:[#allocation5 + $0xec] ss:$16 sps:$4 sm:$0xff]  }
  0x9a   : > { %v3491_v33 = vld [vmem:[#allocation5 + $0x3e4] ss:$16 sps:$4 sm:$0xff]   ;;  %v3494_v35 = vld [vmem:[#allocation5 + $0x3e0] ss:$16 sps:$4 sm:$0xff]  }
  0x9b   : > { %1658 = vmatpush1.bf16.msra.mxu0 %v3469_v18  ;;  %v3495_v36 = vld [vmem:[#allocation5 + $0x1c4] ss:$16 sps:$4 sm:$0xff]   ;;  %v3499_v38 = vld [vmem:[#allocation5 + $0x1c0] ss:$16 sps:$4 sm:$0xff]  }
  0x9c   : > { %1701 = vmatpush1.bf16.msra.mxu1 %v3470_v19  ;;  %1659 = vmatprep.subr.bf16.mxu0 %v3471_v20  ;;  %v3497_v37 = vld [vmem:[#allocation5 + $0x3c4] ss:$16 sps:$4 sm:$0xff]   ;;  %v3500_v39 = vld [vmem:[#allocation5 + $0x3c0] ss:$16 sps:$4 sm:$0xff]   ;;  %v439_v20 = vld [vmem:[%s4331_s28 + $0x68] sm:$0xff] }
  0x9d   : > { %1702 = vmatprep.subr.bf16.mxu1 %v3473_v21  ;;  %v3501_v40 = vld [vmem:[#allocation5 + $0x1a4] ss:$16 sps:$4 sm:$0xff]   ;;  %v3505_v42 = vld [vmem:[#allocation5 + $0x1a0] ss:$16 sps:$4 sm:$0xff]   ;;  %v4113_v21 = vmov 0  }
  0x9e   : > { %v3503_v41 = vld [vmem:[#allocation5 + $0x3a4] ss:$16 sps:$4 sm:$0xff]   ;;  %v3506_v43 = vld [vmem:[#allocation5 + $0x3a0] ss:$16 sps:$4 sm:$0xff]  }
  0x9f   : > { %1660 = vmatpush1.bf16.msra.mxu0 %v3475_v22  ;;  %v3507_v44 = vld [vmem:[#allocation5 + $0x184] ss:$16 sps:$4 sm:$0xff]   ;;  %v3511_v50 = vld [vmem:[#allocation5 + $0x180] ss:$16 sps:$4 sm:$0xff]  }
  0xa0   : > { %1703 = vmatpush1.bf16.msra.mxu1 %v3476_v23  ;;  %1661 = vmatprep.subr.bf16.mxu0 %v3477_v24  ;;  %v3509_v45 = vld [vmem:[#allocation5 + $0x384] ss:$16 sps:$4 sm:$0xff]   ;;  %v3512_v51 = vld [vmem:[#allocation5 + $0x380] ss:$16 sps:$4 sm:$0xff]   ;;  %v3546_v24 = vld [vmem:[#allocation5 + $0xe8] ss:$16 sps:$4 sm:$0xff]  }
  0xa1   : > { %1704 = vmatprep.subr.bf16.mxu1 %v3479_v25  ;;  %v434_v47 = vld [vmem:[%s4331_s28 + $0x40] sm:$0xff]  ;;  %v436_v49 = vld [vmem:[%s4331_s28 + $0x50] sm:$0xff] }
  0xa2   : > { %v3513_v52 = vld [vmem:[#allocation5 + $0x164] ss:$16 sps:$4 sm:$0xff]   ;;  %v4353_v53 = vpack.c.bf16 %v434_v47, %v427_v46  ;;  %v4355_v54 = vpack.c.bf16 %v436_v49, %v429_v48  ;;  %v3517_v56 = vld [vmem:[#allocation5 + $0x160] ss:$16 sps:$4 sm:$0xff]   ;;  %v3576_v47 = vld [vmem:[#allocation5 + $0x48] ss:$16 sps:$4 sm:$0xff]  }
  0xa3   : > { %1662 = vmatpush1.bf16.msra.mxu0 %v3481_v26  ;;  %v3515_v55 = vld [vmem:[#allocation5 + $0x364] ss:$16 sps:$4 sm:$0xff]   ;;  %v3518_v57 = vld [vmem:[#allocation5 + $0x360] ss:$16 sps:$4 sm:$0xff]   ;;  %v3554_v26 = vld [vmem:[#allocation5 + $0xcc] ss:$16 sps:$4 sm:$0xff]  }
  0xa4   : > { %1705 = vmatpush1.bf16.msra.mxu1 %v3482_v27  ;;  %1663 = vmatprep.subr.bf16.mxu0 %v3483_v28  ;;  %v3519_v58 = vld [vmem:[#allocation5 + $0x144] ss:$16 sps:$4 sm:$0xff]   ;;  %v3523_v60 = vld [vmem:[#allocation5 + $0x140] ss:$16 sps:$4 sm:$0xff]   ;;  %v3552_v28 = vld [vmem:[#allocation5 + $0xc8] ss:$16 sps:$4 sm:$0xff]  }
  0xa5   : > { %1706 = vmatprep.subr.bf16.mxu1 %v3485_v29  ;;  %1681 = vmatprep.mubr.bf16.mxu0 %v4353_v53  ;;  %v3521_v59 = vld [vmem:[#allocation5 + $0x344] ss:$16 sps:$4 sm:$0xff]   ;;  %v3524_v61 = vld [vmem:[#allocation5 + $0x340] ss:$16 sps:$4 sm:$0xff]   ;;  %v3584_v49 = vld [vmem:[#allocation5 + $0x2c] ss:$16 sps:$4 sm:$0xff]  }
  0xa6   : > { %1724 = vmatprep.mubr.bf16.mxu1 %v4355_v54  ;;  %v3525_v62 = vld [vmem:[#allocation5 + $0x124] ss:$16 sps:$4 sm:$0xff]   ;;  %v3529_v0 = vld [vmem:[#allocation5 + $0x120] ss:$16 sps:$4 sm:$0xff]  }
  0xa7   : > { %1664 = vmatpush1.bf16.msra.mxu0 %v3487_v30  ;;  %v3527_v63 = vld [vmem:[#allocation5 + $0x324] ss:$16 sps:$4 sm:$0xff]   ;;  %v3530_v1 = vld [vmem:[#allocation5 + $0x320] ss:$16 sps:$4 sm:$0xff]   ;;  %v3560_v30 = vld [vmem:[#allocation5 + $0xac] ss:$16 sps:$4 sm:$0xff]  }
  0xa8   : > { %1707 = vmatpush1.bf16.msra.mxu1 %v3488_v31  ;;  %1665 = vmatprep.subr.bf16.mxu0 %v3489_v32  ;;  %v3531_v2 = vld [vmem:[#allocation5 + $0x104] ss:$16 sps:$4 sm:$0xff]   ;;  %v3535_v4 = vld [vmem:[#allocation5 + $0x100] ss:$16 sps:$4 sm:$0xff]   ;;  %v3558_v32 = vld [vmem:[#allocation5 + $0xa8] ss:$16 sps:$4 sm:$0xff]  }
  0xa9   : > { %1708 = vmatprep.subr.bf16.mxu1 %v3491_v33  ;;  %v3533_v3 = vld [vmem:[#allocation5 + $0x304] ss:$16 sps:$4 sm:$0xff]   ;;  %v3536_v5 = vld [vmem:[#allocation5 + $0x300] ss:$16 sps:$4 sm:$0xff]  }
  0xaa   : > { %v426_v6 = vld [vmem:[%s4331_s28] sm:$0xff]  ;;  %v428_v8 = vld [vmem:[%s4331_s28 + $0x10] sm:$0xff] }
  0xab   : > { %1666 = vmatpush2.bf16.msra.mxu0 %v3493_v34  ;;  %v3539_v10 = vld [vmem:[#allocation5 + $0x4e4] ss:$16 sps:$4 sm:$0xff]   ;;  %v4363_v12 = vpack.c.bf16 %v433_v7, %v426_v6  ;;  %v4365_v13 = vpack.c.bf16 %v435_v9, %v428_v8  ;;  %v3537_v14 = vld [vmem:[#allocation5 + $0x4e0] ss:$16 sps:$4 sm:$0xff]   ;;  %v3566_v34 = vld [vmem:[#allocation5 + $0x8c] ss:$16 sps:$4 sm:$0xff]  }
  0xac   : > { %1709 = vmatpush2.bf16.msra.mxu1 %v3494_v35  ;;  %1667 = vmatprep.subr.bf16.mxu0 %v3495_v36  ;;  %v3542_v11 = vld [vmem:[#allocation5 + $0x604] ss:$16 sps:$4 sm:$0xff]   ;;  %v3540_v15 = vld [vmem:[#allocation5 + $0x600] ss:$16 sps:$4 sm:$0xff]   ;;  %v3564_v36 = vld [vmem:[#allocation5 + $0x88] ss:$16 sps:$4 sm:$0xff]  }
  0xad   : > { %1710 = vmatprep.subr.bf16.mxu1 %v3497_v37  ;;  %v3545_v16 = vld [vmem:[#allocation5 + $0x4c4] ss:$16 sps:$4 sm:$0xff]   ;;  %v3543_v18 = vld [vmem:[#allocation5 + $0x4c0] ss:$16 sps:$4 sm:$0xff]   ;;  %v3614_v6 = vld [vmem:[#allocation5 + $0x18c] ss:$16 sps:$4 sm:$0xff]  }
  0xae   : > { %v432_v19 = vld [vmem:[%s4331_s28 + $0x30] sm:$0xff]  ;;  %v3612_v8 = vld [vmem:[#allocation5 + $0x188] ss:$16 sps:$4 sm:$0xff]  }
  0xaf   : > { %1668 = vmatpush2.bf16.msra.mxu0 %v3499_v38  ;;  %v3551_v22 = vld [vmem:[#allocation5 + $0x4a4] ss:$16 sps:$4 sm:$0xff]   ;;  %v4372_v23 = vpack.c.bf16 %v439_v20, %v432_v19  ;;  %v3549_v25 = vld [vmem:[#allocation5 + $0x4a0] ss:$16 sps:$4 sm:$0xff]   ;;  %v3572_v38 = vld [vmem:[#allocation5 + $0x6c] ss:$16 sps:$4 sm:$0xff]  }
  0xb0   : > { %1711 = vmatpush2.bf16.msra.mxu1 %v3500_v39  ;;  %1669 = vmatprep.subr.bf16.mxu0 %v3501_v40  ;;  %v3557_v27 = vld [vmem:[#allocation5 + $0x484] ss:$16 sps:$4 sm:$0xff]   ;;  %v3555_v29 = vld [vmem:[#allocation5 + $0x480] ss:$16 sps:$4 sm:$0xff]   ;;  %v3570_v40 = vld [vmem:[#allocation5 + $0x68] ss:$16 sps:$4 sm:$0xff]  }
  0xb1   : > { %1712 = vmatprep.subr.bf16.mxu1 %v3503_v41  ;;  %v3563_v31 = vld [vmem:[#allocation5 + $0x464] ss:$16 sps:$4 sm:$0xff]   ;;  %v3561_v33 = vld [vmem:[#allocation5 + $0x460] ss:$16 sps:$4 sm:$0xff]   ;;  %v431_v41 = vld [vmem:[%s4331_s28 + $0x28] sm:$0xff] }
  0xb2   : > { %v3569_v35 = vld [vmem:[#allocation5 + $0x444] ss:$16 sps:$4 sm:$0xff]   ;;  %v3567_v37 = vld [vmem:[#allocation5 + $0x440] ss:$16 sps:$4 sm:$0xff]  }
  0xb3   : > { %1670 = vmatpush2.bf16.msra.mxu0 %v3505_v42  ;;  %v3575_v39 = vld [vmem:[#allocation5 + $0x424] ss:$16 sps:$4 sm:$0xff]   ;;  %v3579_v48 = vld [vmem:[#allocation5 + $0x400] ss:$16 sps:$4 sm:$0xff]  }
  0xb4   : > { %1713 = vmatpush2.bf16.msra.mxu1 %v3506_v43  ;;  %1671 = vmatprep.subr.bf16.mxu0 %v3507_v44  ;;  %v438_v42 = vld [vmem:[%s4331_s28 + $0x60] sm:$0xff] }
  0xb5   : > { %1714 = vmatprep.subr.bf16.mxu1 %v3509_v45  ;;  %v3573_v43 = vld [vmem:[#allocation5 + $0x420] ss:$16 sps:$4 sm:$0xff]   ;;  %v4379_v44 = vpack.c.bf16 %v438_v42, %v431_v41  ;;  %v3578_v45 = vld [vmem:[#allocation5 + $0x4c] ss:$16 sps:$4 sm:$0xff]   ;;  %v3581_v46 = vld [vmem:[#allocation5 + $0x404] ss:$16 sps:$4 sm:$0xff]  }
  0xb6   : > { %v3617_v7 = vld [vmem:[#allocation5 + $0x544] ss:$16 sps:$4 sm:$0xff]   ;;  %v3615_v9 = vld [vmem:[#allocation5 + $0x540] ss:$16 sps:$4 sm:$0xff]   ;;  %v3656_v41 = vld [vmem:[#allocation5 + $0x4ac] ss:$16 sps:$4 sm:$0xff]  }
  0xb7   : > { %1672 = vmatpush2.bf16.msra.mxu0 %v3511_v50  ;;  %v3587_v50 = vld [vmem:[#allocation5 + $0x5e4] ss:$16 sps:$4 sm:$0xff]   ;;  %v3627_v19 = vld [vmem:[#allocation5 + $0x500] ss:$16 sps:$4 sm:$0xff]   ;;  %v3659_v42 = vld [vmem:[#allocation5 + $0x26c] ss:$16 sps:$4 sm:$0xff]  }
  0xb8   : > { %1715 = vmatpush2.bf16.msra.mxu1 %v3512_v51  ;;  %1673 = vmatprep.subr.bf16.mxu0 %v3513_v52  ;;  %v3582_v51 = vld [vmem:[#allocation5 + $0x28] ss:$16 sps:$4 sm:$0xff]   ;;  %v3585_v52 = vld [vmem:[#allocation5 + $0x5e0] ss:$16 sps:$4 sm:$0xff]  }
  0xb9   : > { %1716 = vmatprep.subr.bf16.mxu1 %v3515_v55  ;;  %v3593_v55 = vld [vmem:[#allocation5 + $0x5c4] ss:$16 sps:$4 sm:$0xff]  }
  0xba   : > { %v430_v20 = vld [vmem:[%s4331_s28 + $0x20] sm:$0xff] }
  0xbb   : > { %1674 = vmatpush2.bf16.msra.mxu0 %v3517_v56  ;;  %v3588_v56 = vld [vmem:[#allocation5 + $0x8] ss:$16 sps:$4 sm:$0xff]  }
  0xbc   : > { %1717 = vmatpush2.bf16.msra.mxu1 %v3518_v57  ;;  %1675 = vmatprep.subr.bf16.mxu0 %v3519_v58  ;;  %v3591_v57 = vld [vmem:[#allocation5 + $0x5c0] ss:$16 sps:$4 sm:$0xff]   ;;  %v3596_v58 = vld [vmem:[#allocation5 + $0x1ec] ss:$16 sps:$4 sm:$0xff]  }
  0xbd   : > { %1718 = vmatprep.subr.bf16.mxu1 %v3521_v59  ;;  %v3599_v59 = vld [vmem:[#allocation5 + $0x5a4] ss:$16 sps:$4 sm:$0xff]  }
  0xbf   : > { %1676 = vmatpush2.bf16.msra.mxu0 %v3523_v60  ;;  %v3594_v60 = vld [vmem:[#allocation5 + $0x1e8] ss:$16 sps:$4 sm:$0xff]  }
  0xc0   : > { %1719 = vmatpush2.bf16.msra.mxu1 %v3524_v61  ;;  %1677 = vmatprep.subr.bf16.mxu0 %v3525_v62  ;;  %v3597_v61 = vld [vmem:[#allocation5 + $0x5a0] ss:$16 sps:$4 sm:$0xff]   ;;  %v3602_v62 = vld [vmem:[#allocation5 + $0x1cc] ss:$16 sps:$4 sm:$0xff]  }
  0xc1   : > { %1720 = vmatprep.subr.bf16.mxu1 %v3527_v63  ;;  %v3605_v63 = vld [vmem:[#allocation5 + $0x584] ss:$16 sps:$4 sm:$0xff]  }
  0xc3   : > { %1678 = vmatpush2.bf16.msra.mxu0 %v3529_v0  ;;  %v3600_v0 = vld [vmem:[#allocation5 + $0x1c8] ss:$16 sps:$4 sm:$0xff]  }
  0xc4   : > { %1721 = vmatpush2.bf16.msra.mxu1 %v3530_v1  ;;  %1679 = vmatprep.subr.bf16.mxu0 %v3531_v2  ;;  %v3603_v1 = vld [vmem:[#allocation5 + $0x580] ss:$16 sps:$4 sm:$0xff]   ;;  %v3608_v2 = vld [vmem:[#allocation5 + $0x1ac] ss:$16 sps:$4 sm:$0xff]  }
  0xc5   : > { %1722 = vmatprep.subr.bf16.mxu1 %v3533_v3  ;;  %v3611_v3 = vld [vmem:[#allocation5 + $0x564] ss:$16 sps:$4 sm:$0xff]  }
  0xc7   : > { %1680 = vmatpush2.bf16.msra.mxu0 %v3535_v4  ;;  %v3606_v4 = vld [vmem:[#allocation5 + $0x1a8] ss:$16 sps:$4 sm:$0xff]  }
  0xc8   : > { %1723 = vmatpush2.bf16.msra.mxu1 %v3536_v5  ;;  %1735 = vmatprep.subr.bf16.mxu0 %v3539_v10  ;;  %v3609_v5 = vld [vmem:[#allocation5 + $0x560] ss:$16 sps:$4 sm:$0xff]   ;;  %v3620_v10 = vld [vmem:[#allocation5 + $0x16c] ss:$16 sps:$4 sm:$0xff]  }
  0xc9   : > { %1792 = vmatprep.subr.bf16.mxu1 %v3542_v11  ;;  %v3623_v11 = vld [vmem:[#allocation5 + $0x524] ss:$16 sps:$4 sm:$0xff]  }
  0xca   : > { %1682 = vmatmul.mubr.bf16.vlgmr.msra.gmra.mxu0 %v4363_v12 }
  0xcb   : > { %1725 = vmatmul.mubr.bf16.vlgmr.msra.gmra.mxu1 %v4365_v13  ;;  %1736 = vmatpush1.bf16.msra.mxu0 %v3537_v14  ;;  %v3618_v14 = vld [vmem:[#allocation5 + $0x168] ss:$16 sps:$4 sm:$0xff]  }
  0xcc   : > { %1793 = vmatpush1.bf16.msra.mxu1 %v3540_v15  ;;  %1737 = vmatprep.subr.bf16.mxu0 %v3545_v16  ;;  %v3621_v15 = vld [vmem:[#allocation5 + $0x520] ss:$16 sps:$4 sm:$0xff]   ;;  %v3626_v16 = vld [vmem:[#allocation5 + $0x14c] ss:$16 sps:$4 sm:$0xff]  }
  0xcd   : > { %1810 = vmatprep.mubr.bf16.mxu1 %v4113_v21  ;;  %1821 = vmatprep.subr.bf16.mxu1 %v3548_v17  ;;  %v3629_v17 = vld [vmem:[#allocation5 + $0x504] ss:$16 sps:$4 sm:$0xff]  }
  0xce   : > { %1767 = vmatprep.mubr.bf16.mxu0 %v4379_v44 }
  0xcf   : > { %1738 = vmatpush1.bf16.msra.mxu0 %v3543_v18  ;;  %v3624_v18 = vld [vmem:[#allocation5 + $0x148] ss:$16 sps:$4 sm:$0xff]  }
  0xd0   : > { %1739 = vmatprep.subr.bf16.mxu0 %v3551_v22  ;;  %v437_v22 = vld [vmem:[%s4331_s28 + $0x58] sm:$0xff]  ;;  %s2822_s28 = scalar_lea.sflag [#allocation4], %s4327_s17 }
  0xd3   : > { %3170 = vmatmul.mubr.msk.bf16.vlgmr.msra.gmra.mxu1 %vm1645_vm0, %v4372_v23  ;;  %1740 = vmatpush1.bf16.msra.mxu0 %v3549_v25  ;;  %v3635_v25 = vld [vmem:[#allocation5 + $0x2ec] ss:$16 sps:$4 sm:$0xff]  }
  0xd4   : > { %1822 = vmatpush1.bf16.msra.mxu1 %v3546_v24  ;;  %1741 = vmatprep.subr.bf16.mxu0 %v3557_v27  ;;  %v3632_v24 = vld [vmem:[#allocation5 + $0x12c] ss:$16 sps:$4 sm:$0xff]   ;;  %v3630_v27 = vld [vmem:[#allocation5 + $0x128] ss:$16 sps:$4 sm:$0xff]  }
  0xd5   : > { %1823 = vmatprep.subr.bf16.mxu1 %v3554_v26  ;;  %1853 = vmatprep.mubr.bf16.mxu1 %v4353_v53  ;;  %v3590_v53 = vld [vmem:[#allocation5 + $0xc] ss:$16 sps:$4 sm:$0xff]   ;;  %v4384_v26 = vpack.c.bf16 %v437_v22, %v430_v20  ;;  %v3714_v20 = vld [vmem:[#allocation5 + $0x568] ss:$16 sps:$4 sm:$0xff]  }
  0xd6   : > { %v3717_v22 = vld [vmem:[#allocation5 + $0x328] ss:$16 sps:$4 sm:$0xff]  }
  0xd7   : > { %1742 = vmatpush1.bf16.msra.mxu0 %v3555_v29  ;;  %v3638_v29 = vld [vmem:[#allocation5 + $0x10c] ss:$16 sps:$4 sm:$0xff]  }
  0xd8   : > { %1824 = vmatpush1.bf16.msra.mxu1 %v3552_v28  ;;  %1743 = vmatprep.subr.bf16.mxu0 %v3563_v31  ;;  %v3633_v28 = vld [vmem:[#allocation5 + $0x2e8] ss:$16 sps:$4 sm:$0xff]  }
  0xd9   : > { %1825 = vmatprep.subr.bf16.mxu1 %v3560_v30  ;;  %v3641_v30 = vld [vmem:[#allocation5 + $0x2cc] ss:$16 sps:$4 sm:$0xff]   ;;  %v3636_v31 = vld [vmem:[#allocation5 + $0x108] ss:$16 sps:$4 sm:$0xff]  }
  0xdb   : > { %1744 = vmatpush1.bf16.msra.mxu0 %v3561_v33  ;;  %v3644_v33 = vld [vmem:[#allocation5 + $0x4ec] ss:$16 sps:$4 sm:$0xff]  }
  0xdc   : > { %1826 = vmatpush1.bf16.msra.mxu1 %v3558_v32  ;;  %1745 = vmatprep.subr.bf16.mxu0 %v3569_v35  ;;  %v3639_v32 = vld [vmem:[#allocation5 + $0x2c8] ss:$16 sps:$4 sm:$0xff]  }
  0xdd   : > { %1827 = vmatprep.subr.bf16.mxu1 %v3566_v34  ;;  %v3647_v34 = vld [vmem:[#allocation5 + $0x2ac] ss:$16 sps:$4 sm:$0xff]   ;;  %v3642_v35 = vld [vmem:[#allocation5 + $0x4e8] ss:$16 sps:$4 sm:$0xff]  }
  0xdf   : > { %1746 = vmatpush1.bf16.msra.mxu0 %v3567_v37  ;;  %v3650_v37 = vld [vmem:[#allocation5 + $0x4cc] ss:$16 sps:$4 sm:$0xff]  }
  0xe0   : > { %1828 = vmatpush1.bf16.msra.mxu1 %v3564_v36  ;;  %1747 = vmatprep.subr.bf16.mxu0 %v3575_v39  ;;  %v3645_v36 = vld [vmem:[#allocation5 + $0x2a8] ss:$16 sps:$4 sm:$0xff]  }
  0xe1   : > { %1829 = vmatprep.subr.bf16.mxu1 %v3572_v38  ;;  %v3653_v38 = vld [vmem:[#allocation5 + $0x28c] ss:$16 sps:$4 sm:$0xff]   ;;  %v3648_v39 = vld [vmem:[#allocation5 + $0x4c8] ss:$16 sps:$4 sm:$0xff]  }
  0xe3   : > { %1748 = vmatpush1.bf16.msra.mxu0 %v3573_v43  ;;  %v3654_v43 = vld [vmem:[#allocation5 + $0x4a8] ss:$16 sps:$4 sm:$0xff]  }
  0xe4   : > { %1830 = vmatpush1.bf16.msra.mxu1 %v3570_v40  ;;  %1749 = vmatprep.subr.bf16.mxu0 %v3581_v46  ;;  %v3651_v40 = vld [vmem:[#allocation5 + $0x288] ss:$16 sps:$4 sm:$0xff]   ;;  %v3665_v46 = vld [vmem:[#allocation5 + $0x24c] ss:$16 sps:$4 sm:$0xff]  }
  0xe5   : > { %1831 = vmatprep.subr.bf16.mxu1 %v3578_v45  ;;  %v3657_v45 = vld [vmem:[#allocation5 + $0x268] ss:$16 sps:$4 sm:$0xff]  }
  0xe7   : > { %1750 = vmatpush1.bf16.msra.mxu0 %v3579_v48  ;;  %v3668_v48 = vld [vmem:[#allocation5 + $0x46c] ss:$16 sps:$4 sm:$0xff]  }
  0xe8   : > { %1832 = vmatpush1.bf16.msra.mxu1 %v3576_v47  ;;  %1751 = vmatprep.subr.bf16.mxu0 %v3587_v50  ;;  %v3660_v47 = vld [vmem:[#allocation5 + $0x488] ss:$16 sps:$4 sm:$0xff]  }
  0xe9   : > { %1833 = vmatprep.subr.bf16.mxu1 %v3584_v49  ;;  %v3671_v49 = vld [vmem:[#allocation5 + $0x22c] ss:$16 sps:$4 sm:$0xff]   ;;  %v3666_v50 = vld [vmem:[#allocation5 + $0x468] ss:$16 sps:$4 sm:$0xff]  }
  0xeb   : > { %1752 = vmatpush2.bf16.msra.mxu0 %v3585_v52  ;;  %v3674_v52 = vld [vmem:[#allocation5 + $0x44c] ss:$16 sps:$4 sm:$0xff]  }
  0xec   : > { %1834 = vmatpush1.bf16.msra.mxu1 %v3582_v51  ;;  %1753 = vmatprep.subr.bf16.mxu0 %v3593_v55  ;;  %v3669_v51 = vld [vmem:[#allocation5 + $0x228] ss:$16 sps:$4 sm:$0xff]  }
  0xed   : > { %1835 = vmatprep.subr.bf16.mxu1 %v3590_v53  ;;  %v3672_v53 = vld [vmem:[#allocation5 + $0x448] ss:$16 sps:$4 sm:$0xff]  }
  0xee   : > { %v3675_v55 = vld [vmem:[#allocation5 + $0x208] ss:$16 sps:$4 sm:$0xff]  }
  0xef   : > { %1754 = vmatpush2.bf16.msra.mxu0 %v3591_v57  ;;  %v3683_v57 = vld [vmem:[#allocation5 + $0x3ec] ss:$16 sps:$4 sm:$0xff]  }
  0xf0   : > { %1836 = vmatpush1.bf16.msra.mxu1 %v3588_v56  ;;  %1755 = vmatprep.subr.bf16.mxu0 %v3599_v59  ;;  %v3680_v56 = vld [vmem:[#allocation5 + $0x42c] ss:$16 sps:$4 sm:$0xff]   ;;  %v3681_v59 = vld [vmem:[#allocation5 + $0x3e8] ss:$16 sps:$4 sm:$0xff]  }
  0xf1   : > { %1837 = vmatprep.subr.bf16.mxu1 %v3596_v58  ;;  %v3678_v58 = vld [vmem:[#allocation5 + $0x428] ss:$16 sps:$4 sm:$0xff]  }
  0xf3   : > { %1756 = vmatpush2.bf16.msra.mxu0 %v3597_v61  ;;  %v3689_v61 = vld [vmem:[#allocation5 + $0x3cc] ss:$16 sps:$4 sm:$0xff]  }
  0xf4   : > { %1838 = vmatpush2.bf16.msra.mxu1 %v3594_v60  ;;  %1757 = vmatprep.subr.bf16.mxu0 %v3605_v63  ;;  %v3686_v60 = vld [vmem:[#allocation5 + $0x40c] ss:$16 sps:$4 sm:$0xff]   ;;  %v3687_v63 = vld [vmem:[#allocation5 + $0x3c8] ss:$16 sps:$4 sm:$0xff]  }
  0xf5   : > { %1839 = vmatprep.subr.bf16.mxu1 %v3602_v62  ;;  %v3684_v62 = vld [vmem:[#allocation5 + $0x408] ss:$16 sps:$4 sm:$0xff]  }
  0xf7   : > { %1758 = vmatpush2.bf16.msra.mxu0 %v3603_v1  ;;  %v3695_v1 = vld [vmem:[#allocation5 + $0x3ac] ss:$16 sps:$4 sm:$0xff]  }
  0xf8   : > { %1840 = vmatpush2.bf16.msra.mxu1 %v3600_v0  ;;  %1759 = vmatprep.subr.bf16.mxu0 %v3611_v3  ;;  %v3692_v0 = vld [vmem:[#allocation5 + $0x5ec] ss:$16 sps:$4 sm:$0xff]   ;;  %v3693_v3 = vld [vmem:[#allocation5 + $0x3a8] ss:$16 sps:$4 sm:$0xff]  }
  0xf9   : > { %1841 = vmatprep.subr.bf16.mxu1 %v3608_v2  ;;  %v3690_v2 = vld [vmem:[#allocation5 + $0x5e8] ss:$16 sps:$4 sm:$0xff]  }
  0xfb   : > { %1760 = vmatpush2.bf16.msra.mxu0 %v3609_v5  ;;  %v3701_v5 = vld [vmem:[#allocation5 + $0x38c] ss:$16 sps:$4 sm:$0xff]  }
  0xfc   : > { %1842 = vmatpush2.bf16.msra.mxu1 %v3606_v4  ;;  %1761 = vmatprep.subr.bf16.mxu0 %v3617_v7  ;;  %v3698_v4 = vld [vmem:[#allocation5 + $0x5cc] ss:$16 sps:$4 sm:$0xff]   ;;  %v3699_v7 = vld [vmem:[#allocation5 + $0x388] ss:$16 sps:$4 sm:$0xff]  }
  0xfd   : > { %1843 = vmatprep.subr.bf16.mxu1 %v3614_v6  ;;  %v3696_v6 = vld [vmem:[#allocation5 + $0x5c8] ss:$16 sps:$4 sm:$0xff]  }
  0xff   : > { %1762 = vmatpush2.bf16.msra.mxu0 %v3615_v9  ;;  %v3707_v9 = vld [vmem:[#allocation5 + $0x36c] ss:$16 sps:$4 sm:$0xff]  }
 0x100   : > { %1844 = vmatpush2.bf16.msra.mxu1 %v3612_v8  ;;  %1763 = vmatprep.subr.bf16.mxu0 %v3623_v11  ;;  %v3704_v8 = vld [vmem:[#allocation5 + $0x5ac] ss:$16 sps:$4 sm:$0xff]   ;;  %v3705_v11 = vld [vmem:[#allocation5 + $0x368] ss:$16 sps:$4 sm:$0xff]  }
 0x101   : > { %1845 = vmatprep.subr.bf16.mxu1 %v3620_v10  ;;  %v3702_v10 = vld [vmem:[#allocation5 + $0x5a8] ss:$16 sps:$4 sm:$0xff]  }
 0x103   : > { %1764 = vmatpush2.bf16.msra.mxu0 %v3621_v15  ;;  %v3713_v15 = vld [vmem:[#allocation5 + $0x34c] ss:$16 sps:$4 sm:$0xff]  }
 0x104   : > { %1846 = vmatpush2.bf16.msra.mxu1 %v3618_v14  ;;  %1765 = vmatprep.subr.bf16.mxu0 %v3629_v17  ;;  %v3710_v14 = vld [vmem:[#allocation5 + $0x58c] ss:$16 sps:$4 sm:$0xff]   ;;  %v3711_v17 = vld [vmem:[#allocation5 + $0x348] ss:$16 sps:$4 sm:$0xff]  }
 0x105   : > { %1847 = vmatprep.subr.bf16.mxu1 %v3626_v16  ;;  %v3708_v16 = vld [vmem:[#allocation5 + $0x588] ss:$16 sps:$4 sm:$0xff]  }
 0x107   : > { %1766 = vmatpush2.bf16.msra.mxu0 %v3627_v19  ;;  %v3719_v19 = vld [vmem:[#allocation5 + $0x32c] ss:$16 sps:$4 sm:$0xff]  }
 0x108   : > { %1848 = vmatpush2.bf16.msra.mxu1 %v3624_v18  ;;  %1864 = vmatprep.subr.bf16.mxu0 %v3635_v25  ;;  %v3716_v18 = vld [vmem:[#allocation5 + $0x56c] ss:$16 sps:$4 sm:$0xff]  }
 0x109   : > { %1849 = vmatprep.subr.bf16.mxu1 %v3632_v24  ;;  %v3722_v24 = vld [vmem:[#allocation5 + $0x54c] ss:$16 sps:$4 sm:$0xff]  }
 0x10a   : > { %1768 = vmatmul.mubr.bf16.vlgmr.msra.gmra.mxu0 %v4384_v26  ;;  %v3725_v25 = vld [vmem:[#allocation5 + $0x30c] ss:$16 sps:$4 sm:$0xff]  }
 0x10b   : > { %1865 = vmatpush1.bf16.msra.mxu0 %v3633_v28  ;;  %1896 = vmatprep.mubr.bf16.mxu0 %v4355_v54  ;;  %v3662_v54 = vld [vmem:[#allocation5 + $0x48c] ss:$16 sps:$4 sm:$0xff]   ;;  %v3723_v28 = vld [vmem:[#allocation5 + $0x308] ss:$16 sps:$4 sm:$0xff]  }
 0x10c   : > { %1850 = vmatpush2.bf16.msra.mxu1 %v3630_v27  ;;  %1866 = vmatprep.subr.bf16.mxu0 %v3641_v30  ;;  %v3720_v27 = vld [vmem:[#allocation5 + $0x548] ss:$16 sps:$4 sm:$0xff]   ;;  %v3731_v30 = vld [vmem:[#allocation5 + $0x60c] ss:$16 sps:$4 sm:$0xff]  }
 0x10d   : > { %1851 = vmatprep.subr.bf16.mxu1 %v3638_v29  ;;  %v3728_v29 = vld [vmem:[#allocation5 + $0x52c] ss:$16 sps:$4 sm:$0xff]  }
 0x10f   : > { %1867 = vmatpush1.bf16.msra.mxu0 %v3639_v32  ;;  %v3729_v32 = vld [vmem:[#allocation5 + $0x608] ss:$16 sps:$4 sm:$0xff]  }
 0x110   : > { %1852 = vmatpush2.bf16.msra.mxu1 %v3636_v31  ;;  %1868 = vmatprep.subr.bf16.mxu0 %v3647_v34  ;;  %v3726_v31 = vld [vmem:[#allocation5 + $0x528] ss:$16 sps:$4 sm:$0xff]  }
 0x111   : > { %1907 = vmatprep.subr.bf16.mxu1 %v3644_v33  ;;  %v3734_v33 = vld [vmem:[#allocation5 + $0x50c] ss:$16 sps:$4 sm:$0xff]   ;;  %v3737_v34 = vld [vmem:[#allocation8 + $0x74] ss:$8 sps:$4 sm:$0xff]  }
 0x113   : > { %1854 = vmatmul.mubr.bf16.vlgmr.msra.gmra.mxu1 %v4363_v12  ;;  %1869 = vmatpush1.bf16.msra.mxu0 %v3645_v36  ;;  %v3663_v12 = vld [vmem:[#allocation5 + $0x248] ss:$16 sps:$4 sm:$0xff]   ;;  %v3735_v36 = vld [vmem:[#allocation8 + $0x70] ss:$8 sps:$4 sm:$0xff]  }
 0x114   : > { %1908 = vmatpush1.bf16.msra.mxu1 %v3642_v35  ;;  %1870 = vmatprep.subr.bf16.mxu0 %v3653_v38  ;;  %v3732_v35 = vld [vmem:[#allocation5 + $0x508] ss:$16 sps:$4 sm:$0xff]   ;;  %v3738_v38 = vld [vmem:[#allocation8 + $0x60] ss:$8 sps:$4 sm:$0xff]  }
 0x115   : > { %1909 = vmatprep.subr.bf16.mxu1 %v3650_v37  ;;  %1939 = vmatprep.mubr.bf16.mxu1 %v4379_v44  ;;  %v3677_v44 = vld [vmem:[#allocation5 + $0x20c] ss:$16 sps:$4 sm:$0xff]   ;;  %v3740_v37 = vld [vmem:[#allocation8 + $0x64] ss:$8 sps:$4 sm:$0xff]  }
 0x117   : > { %1871 = vmatpush1.bf16.msra.mxu0 %v3651_v40  ;;  %v3746_v40 = vld [vmem:[#allocation8 + $0x44] ss:$8 sps:$4 sm:$0xff]  }
 0x118   : > { %1910 = vmatpush1.bf16.msra.mxu1 %v3648_v39  ;;  %1872 = vmatprep.subr.bf16.mxu0 %v3659_v42  ;;  %v3743_v39 = vld [vmem:[#allocation8 + $0x54] ss:$8 sps:$4 sm:$0xff]  }
 0x119   : > { %1911 = vmatprep.subr.bf16.mxu1 %v3656_v41  ;;  %v3783_v41 = vld [vmem:[#allocation8 + $0x170] ss:$8 sps:$4 sm:$0xff]   ;;  %v3785_v42 = vld [vmem:[#allocation8 + $0x174] ss:$8 sps:$4 sm:$0xff]  }
 0x11b   : > { %1873 = vmatpush1.bf16.msra.mxu0 %v3657_v45  ;;  %v3749_v45 = vld [vmem:[#allocation8 + $0x34] ss:$8 sps:$4 sm:$0xff]  }
 0x11c   : > { %1912 = vmatpush1.bf16.msra.mxu1 %v3654_v43  ;;  %1874 = vmatprep.subr.bf16.mxu0 %v3665_v46  ;;  %v3788_v43 = vld [vmem:[#allocation8 + $0x164] ss:$8 sps:$4 sm:$0xff]  }
 0x11d   : > { %1913 = vmatprep.subr.bf16.mxu1 %v3662_v54  ;;  %v3747_v54 = vld [vmem:[#allocation8 + $0x30] ss:$8 sps:$4 sm:$0xff]   ;;  %v3752_v46 = vld [vmem:[#allocation8 + $0x24] ss:$8 sps:$4 sm:$0xff]  }
 0x11f   : > { %1875 = vmatpush1.bf16.msra.mxu0 %v3663_v12  ;;  %v3794_v12 = vld [vmem:[#allocation8 + $0x144] ss:$8 sps:$4 sm:$0xff]  }
 0x120   : > { %1914 = vmatpush1.bf16.msra.mxu1 %v3660_v47  ;;  %1876 = vmatprep.subr.bf16.mxu0 %v3671_v49  ;;  %v3789_v47 = vld [vmem:[#allocation8 + $0x150] ss:$8 sps:$4 sm:$0xff]   ;;  %v3755_v49 = vld [vmem:[#allocation8 + $0x14] ss:$8 sps:$4 sm:$0xff]  }
 0x121   : > { %1915 = vmatprep.subr.bf16.mxu1 %v3668_v48  ;;  %v3750_v48 = vld [vmem:[#allocation8 + $0x20] ss:$8 sps:$4 sm:$0xff]  }
 0x123   : > { %1877 = vmatpush1.bf16.msra.mxu0 %v3669_v51  ;;  %v3797_v51 = vld [vmem:[#allocation8 + $0x134] ss:$8 sps:$4 sm:$0xff]  }
 0x124   : > { %1916 = vmatpush1.bf16.msra.mxu1 %v3666_v50  ;;  %1878 = vmatprep.subr.bf16.mxu0 %v3677_v44  ;;  %v3792_v50 = vld [vmem:[#allocation8 + $0x140] ss:$8 sps:$4 sm:$0xff]   ;;  %v3758_v44 = vld [vmem:[#allocation8 + $0x4] ss:$8 sps:$4 sm:$0xff]  }
 0x125   : > { %1917 = vmatprep.subr.bf16.mxu1 %v3674_v52  ;;  %v3753_v52 = vld [vmem:[#allocation8 + $0x10] ss:$8 sps:$4 sm:$0xff]  }
 0x127   : > { %1879 = vmatpush1.bf16.msra.mxu0 %v3675_v55  ;;  %v3800_v55 = vld [vmem:[#allocation8 + $0x124] ss:$8 sps:$4 sm:$0xff]  }
 0x128   : > { %1918 = vmatpush1.bf16.msra.mxu1 %v3672_v53  ;;  %1880 = vmatprep.subr.bf16.mxu0 %v3683_v57  ;;  %v3795_v53 = vld [vmem:[#allocation8 + $0x130] ss:$8 sps:$4 sm:$0xff]   ;;  %v3761_v57 = vld [vmem:[#allocation8 + $0xf4] ss:$8 sps:$4 sm:$0xff]  }
 0x129   : > { %1919 = vmatprep.subr.bf16.mxu1 %v3680_v56  ;;  %v3756_v56 = vld [vmem:[#allocation8] ss:$8 sps:$4 sm:$0xff]  }
 0x12b   : > { %1881 = vmatpush2.bf16.msra.mxu0 %v3681_v59  ;;  %v3803_v59 = vld [vmem:[#allocation8 + $0x114] ss:$8 sps:$4 sm:$0xff]  }
 0x12c   : > { %1920 = vmatpush1.bf16.msra.mxu1 %v3678_v58  ;;  %1882 = vmatprep.subr.bf16.mxu0 %v3689_v61  ;;  %v3798_v58 = vld [vmem:[#allocation8 + $0x120] ss:$8 sps:$4 sm:$0xff]   ;;  %v3764_v61 = vld [vmem:[#allocation8 + $0xe4] ss:$8 sps:$4 sm:$0xff]  }
 0x12d   : > { %1921 = vmatprep.subr.bf16.mxu1 %v3686_v60  ;;  %v3759_v60 = vld [vmem:[#allocation8 + $0xf0] ss:$8 sps:$4 sm:$0xff]  }
 0x12f   : > { %1883 = vmatpush2.bf16.msra.mxu0 %v3687_v63  ;;  %v3806_v63 = vld [vmem:[#allocation8 + $0x104] ss:$8 sps:$4 sm:$0xff]  }
 0x130   : > { %1922 = vmatpush1.bf16.msra.mxu1 %v3684_v62  ;;  %1884 = vmatprep.subr.bf16.mxu0 %v3695_v1  ;;  %v3801_v62 = vld [vmem:[#allocation8 + $0x110] ss:$8 sps:$4 sm:$0xff]   ;;  %v3767_v1 = vld [vmem:[#allocation8 + $0xd4] ss:$8 sps:$4 sm:$0xff]  }
 0x131   : > { %1923 = vmatprep.subr.bf16.mxu1 %v3692_v0  ;;  %v3762_v0 = vld [vmem:[#allocation8 + $0xe0] ss:$8 sps:$4 sm:$0xff]  }
 0x133   : > { %1885 = vmatpush2.bf16.msra.mxu0 %v3693_v3  ;;  %v3809_v3 = vld [vmem:[#allocation8 + $0x1f4] ss:$8 sps:$4 sm:$0xff]  }
 0x134   : > { %1924 = vmatpush2.bf16.msra.mxu1 %v3690_v2  ;;  %1886 = vmatprep.subr.bf16.mxu0 %v3701_v5  ;;  %v3804_v2 = vld [vmem:[#allocation8 + $0x100] ss:$8 sps:$4 sm:$0xff]   ;;  %v3770_v5 = vld [vmem:[#allocation8 + $0xc4] ss:$8 sps:$4 sm:$0xff]  }
 0x135   : > { %1925 = vmatprep.subr.bf16.mxu1 %v3698_v4  ;;  %v3765_v4 = vld [vmem:[#allocation8 + $0xd0] ss:$8 sps:$4 sm:$0xff]  }
 0x137   : > { %1887 = vmatpush2.bf16.msra.mxu0 %v3699_v7  ;;  %v3812_v7 = vld [vmem:[#allocation8 + $0x1e4] ss:$8 sps:$4 sm:$0xff]  }
 0x138   : > { %1926 = vmatpush2.bf16.msra.mxu1 %v3696_v6  ;;  %1888 = vmatprep.subr.bf16.mxu0 %v3707_v9  ;;  %v3807_v6 = vld [vmem:[#allocation8 + $0x1f0] ss:$8 sps:$4 sm:$0xff]   ;;  %v3773_v9 = vld [vmem:[#allocation8 + $0xb4] ss:$8 sps:$4 sm:$0xff]  }
 0x139   : > { %1927 = vmatprep.subr.bf16.mxu1 %v3704_v8  ;;  %v3768_v8 = vld [vmem:[#allocation8 + $0xc0] ss:$8 sps:$4 sm:$0xff]  }
 0x13b   : > { %1889 = vmatpush2.bf16.msra.mxu0 %v3705_v11  ;;  %v3815_v11 = vld [vmem:[#allocation8 + $0x1d4] ss:$8 sps:$4 sm:$0xff]  }
 0x13c   : > { %1928 = vmatpush2.bf16.msra.mxu1 %v3702_v10  ;;  %1890 = vmatprep.subr.bf16.mxu0 %v3713_v15  ;;  %v3810_v10 = vld [vmem:[#allocation8 + $0x1e0] ss:$8 sps:$4 sm:$0xff]   ;;  %v3776_v15 = vld [vmem:[#allocation8 + $0xa4] ss:$8 sps:$4 sm:$0xff]  }
 0x13d   : > { %1929 = vmatprep.subr.bf16.mxu1 %v3710_v14  ;;  %v3771_v14 = vld [vmem:[#allocation8 + $0xb0] ss:$8 sps:$4 sm:$0xff]  }
 0x13f   : > { %1891 = vmatpush2.bf16.msra.mxu0 %v3711_v17  ;;  %v3774_v17 = vld [vmem:[#allocation8 + $0xa0] ss:$8 sps:$4 sm:$0xff]  }
 0x140   : > { %1930 = vmatpush2.bf16.msra.mxu1 %v3708_v16  ;;  %1892 = vmatprep.subr.bf16.mxu0 %v3719_v19  ;;  %v3813_v16 = vld [vmem:[#allocation8 + $0x1d0] ss:$8 sps:$4 sm:$0xff]  }
 0x141   : > { %1931 = vmatprep.subr.bf16.mxu1 %v3716_v18  ;;  %v3779_v18 = vld [vmem:[#allocation8 + $0x94] ss:$8 sps:$4 sm:$0xff]   ;;  %v3777_v19 = vld [vmem:[#allocation8 + $0x90] ss:$8 sps:$4 sm:$0xff]  }
 0x143   : > { %1893 = vmatpush2.bf16.msra.mxu0 %v3717_v22  ;;  %v3780_v22 = vld [vmem:[#allocation8 + $0x80] ss:$8 sps:$4 sm:$0xff]  }
 0x144   : > { %1932 = vmatpush2.bf16.msra.mxu1 %v3714_v20  ;;  %1894 = vmatprep.subr.bf16.mxu0 %v3725_v25  ;;  %v3782_v20 = vld [vmem:[#allocation8 + $0x84] ss:$8 sps:$4 sm:$0xff]   ;;  %v3816_v25 = vld [vmem:[#allocation8 + $0x1c0] ss:$8 sps:$4 sm:$0xff]  }
 0x145   : > { %1933 = vmatprep.subr.bf16.mxu1 %v3722_v24  ;;  %v3818_v24 = vld [vmem:[#allocation8 + $0x1c4] ss:$8 sps:$4 sm:$0xff]  }
 0x147   : > { %1895 = vmatpush2.bf16.msra.mxu0 %v3723_v28  ;;  %v3819_v28 = vld [vmem:[#allocation8 + $0x1b0] ss:$8 sps:$4 sm:$0xff]  }
 0x148   : > { %1934 = vmatpush2.bf16.msra.mxu1 %v3720_v27  ;;  %1964 = vmatprep.subr.bf16.mxu0 %v3731_v30  ;;  %v3821_v27 = vld [vmem:[#allocation8 + $0x1b4] ss:$8 sps:$4 sm:$0xff]   ;;  %v3822_v30 = vld [vmem:[#allocation8 + $0x1a0] ss:$8 sps:$4 sm:$0xff]  }
 0x149   : > { %1935 = vmatprep.subr.bf16.mxu1 %v3728_v29  ;;  %v3824_v29 = vld [vmem:[#allocation8 + $0x1a4] ss:$8 sps:$4 sm:$0xff]  }
 0x14a   : > { %1897 = vmatmul.mubr.bf16.vlgmr.msra.gmra.mxu0 %v4365_v13  ;;  %v3741_v13 = vld [vmem:[#allocation8 + $0x50] ss:$8 sps:$4 sm:$0xff]  }
 0x14b   : > { %1965 = vmatpush1.bf16.msra.mxu0 %v3729_v32  ;;  %1982 = vmatprep.mubr.bf16.mxu0 %v4113_v21  ;;  %v3744_v21 = vld [vmem:[#allocation8 + $0x40] ss:$8 sps:$4 sm:$0xff]   ;;  %v3825_v32 = vld [vmem:[#allocation8 + $0x190] ss:$8 sps:$4 sm:$0xff]  }
 0x14c   : > { %1936 = vmatpush2.bf16.msra.mxu1 %v3726_v31  ;;  %2401 = vmatprep.subr.bf16.mxu0 %v3737_v34  ;;  %v3827_v31 = vld [vmem:[#allocation8 + $0x194] ss:$8 sps:$4 sm:$0xff]   ;;  %v3828_v34 = vld [vmem:[#allocation8 + $0x180] ss:$8 sps:$4 sm:$0xff]  }
 0x14d   : > { %1937 = vmatprep.subr.bf16.mxu1 %v3734_v33  ;;  %v3830_v33 = vld [vmem:[#allocation8 + $0x184] ss:$8 sps:$4 sm:$0xff]  }
 0x150   : > { %1938 = vmatpush2.bf16.msra.mxu1 %v3732_v35 }
 0x151   : > { %2444 = vmatprep.subr.bf16.mxu1 %v3785_v42 }
 0x152   : > { %3171 = vmatmul.mubr.msk.bf16.vlgmr.msra.gmra.mxu0 %vm1645_vm0, %v4372_v23  ;;  %v3791_v23 = vld [vmem:[#allocation8 + $0x154] ss:$8 sps:$4 sm:$0xff]  }
 0x153   : > { %1940 = vmatmul.mubr.bf16.vlgmr.msra.gmra.mxu1 %v4384_v26  ;;  %2402 = vmatpush1.bf16.msra.mxu0 %v3735_v36  ;;  %v3786_v26 = vld [vmem:[#allocation8 + $0x160] ss:$8 sps:$4 sm:$0xff]   ;;  %v645_v36 = vlaneseq }
 0x154   : > { %2403 = vmatprep.subr.bf16.mxu0 %v3740_v37  ;;  %2445 = vmatpush1.bf16.msra.mxu1 %v3783_v41 }
 0x155   : > { %2446 = vmatprep.subr.bf16.mxu1 %v3788_v43 }
 0x157   : > { %2404 = vmatpush1.bf16.msra.mxu0 %v3738_v38  ;;  %v4396_v38 = vshrl.u32 %v645_v36, 7 }
 0x158   : > { %2405 = vmatprep.subr.bf16.mxu0 %v3743_v39  ;;  %2447 = vmatpush1.bf16.msra.mxu1 %v3786_v26 }
 0x159   : > { %2448 = vmatprep.subr.bf16.mxu1 %v3791_v23  ;;  %v647_v41 = vsub.s32 0, %v4396_v38 }
 0x15b   : > { %2406 = vmatpush1.bf16.msra.mxu0 %v3741_v13 }
 0x15c   : > { %2407 = vmatprep.subr.bf16.mxu0 %v3746_v40  ;;  %2449 = vmatpush1.bf16.msra.mxu1 %v3789_v47  ;;  %v651_v40 = vsub.s32 1, %v4396_v38 }
 0x15d   : > { %2450 = vmatprep.subr.bf16.mxu1 %v3794_v12 }
 0x15f   : > { %2408 = vmatpush1.bf16.msra.mxu0 %v3744_v21  ;;  %v643_v21 = vld [vmem:[#allocation7] sm:$0xf] }
 0x160   : > { %2409 = vmatprep.subr.bf16.mxu0 %v3749_v45  ;;  %2451 = vmatpush1.bf16.msra.mxu1 %v3792_v50  ;;  %v652_v45 = vrot.slane %v643_v21, %v651_v40  ;;  %v648_v26 = vrot.slane %v643_v21, %v647_v41 }
 0x161   : > { %2452 = vmatprep.subr.bf16.mxu1 %v3797_v51 }
 0x163   : > { %2410 = vmatpush1.bf16.msra.mxu0 %v3747_v54 }
 0x164   : > { %2411 = vmatprep.subr.bf16.mxu0 %v3752_v46  ;;  %2453 = vmatpush1.bf16.msra.mxu1 %v3795_v53 }
 0x165   : > { %2454 = vmatprep.subr.bf16.mxu1 %v3800_v55 }
 0x167   : > { %2412 = vmatpush1.bf16.msra.mxu0 %v3750_v48 }
 0x168   : > { %2413 = vmatprep.subr.bf16.mxu0 %v3755_v49  ;;  %2455 = vmatpush1.bf16.msra.mxu1 %v3798_v58 }
 0x169   : > { %2456 = vmatprep.subr.bf16.mxu1 %v3803_v59 }
 0x16b   : > { %2414 = vmatpush1.bf16.msra.mxu0 %v3753_v52 }
 0x16c   : > { %2415 = vmatprep.subr.bf16.mxu0 %v3758_v44  ;;  %2457 = vmatpush1.bf16.msra.mxu1 %v3801_v62 }
 0x16d   : > { %2458 = vmatprep.subr.bf16.mxu1 %v3806_v63 }
 0x16f   : > { %2416 = vmatpush1.bf16.msra.mxu0 %v3756_v56 }
 0x170   : > { %2417 = vmatprep.subr.bf16.mxu0 %v3761_v57  ;;  %2459 = vmatpush1.bf16.msra.mxu1 %v3804_v2 }
 0x171   : > { %2460 = vmatprep.subr.bf16.mxu1 %v3809_v3 }
 0x173   : > { %2418 = vmatpush2.bf16.msra.mxu0 %v3759_v60 }
 0x174   : > { %2419 = vmatprep.subr.bf16.mxu0 %v3764_v61  ;;  %2461 = vmatpush2.bf16.msra.mxu1 %v3807_v6 }
 0x175   : > { %2462 = vmatprep.subr.bf16.mxu1 %v3812_v7 }
 0x177   : > { %2420 = vmatpush2.bf16.msra.mxu0 %v3762_v0 }
 0x178   : > { %2421 = vmatprep.subr.bf16.mxu0 %v3767_v1  ;;  %2463 = vmatpush2.bf16.msra.mxu1 %v3810_v10 }
 0x179   : > { %2464 = vmatprep.subr.bf16.mxu1 %v3815_v11 }
 0x17b   : > { %2422 = vmatpush2.bf16.msra.mxu0 %v3765_v4 }
 0x17c   : > { %2423 = vmatprep.subr.bf16.mxu0 %v3770_v5  ;;  %2465 = vmatpush2.bf16.msra.mxu1 %v3813_v16  ;;  %v655_v16 = vsub.s32 2, %v4396_v38 }
 0x17d   : > { %2466 = vmatprep.subr.bf16.mxu1 %v3818_v24 }
 0x17f   : > { %2424 = vmatpush2.bf16.msra.mxu0 %v3768_v8 }
 0x180   : > { %2425 = vmatprep.subr.bf16.mxu0 %v3773_v9  ;;  %2467 = vmatpush2.bf16.msra.mxu1 %v3816_v25 }
 0x181   : > { %2468 = vmatprep.subr.bf16.mxu1 %v3821_v27 }
 0x183   : > { %2426 = vmatpush2.bf16.msra.mxu0 %v3771_v14 }
 0x184   : > { %2427 = vmatprep.subr.bf16.mxu0 %v3776_v15  ;;  %2469 = vmatpush2.bf16.msra.mxu1 %v3819_v28  ;;  %v659_v15 = vsub.s32 3, %v4396_v38 }
 0x185   : > { %2470 = vmatprep.subr.bf16.mxu1 %v3824_v29 }
 0x187   : > { %2428 = vmatpush2.bf16.msra.mxu0 %v3774_v17 }
 0x188   : > { %2429 = vmatprep.subr.bf16.mxu0 %v3779_v18  ;;  %2471 = vmatpush2.bf16.msra.mxu1 %v3822_v30 }
 0x189   : > { %2472 = vmatprep.subr.bf16.mxu1 %v3827_v31 }
 0x18a   : > { %v1683_v39 = vpop.f32.mrf.mxu0 }
 0x18b   : > { %2430 = vmatpush2.bf16.msra.mxu0 %v3777_v19  ;;  %v1726_v35 = vpop.f32.mrf.mxu1  ;;  %v1684_v47 = vadd.f32 %v1683_v39, %v648_v26 }
 0x18c   : > { %2431 = vmatprep.subr.bf16.mxu0 %v3782_v20  ;;  %2473 = vmatpush2.bf16.msra.mxu1 %v3825_v32  ;;  %v1685_v42 = vpop.f32.mrf.mxu0  ;;  %v660_v20 = vrot.slane %v643_v21, %v659_v15  ;;  %v3850_v15 = vld [vmem:[#allocation11 + $0x20] sm:$0xff]  }
 0x18d   : > { %2474 = vmatprep.subr.bf16.mxu1 %v3830_v33  ;;  %v1728_v37 = vpop.f32.mrf.mxu1  ;;  %v1686_v46 = vadd.f32 %v1685_v42, %v652_v45  ;;  %v1727_v44 = vadd.f32 %v1726_v35, %v1684_v47 }
 0x18e   : > { %v1687_v23 = vpop.f32.mrf.mxu0 }
 0x18f   : > { %2432 = vmatpush2.bf16.msra.mxu0 %v3780_v22  ;;  %v1730_v13 = vpop.f32.mrf.mxu1  ;;  %v1688_v48 = vadd.f32 %v1687_v23, %v648_v26  ;;  %v1729_v51 = vadd.f32 %v1728_v37, %v1686_v46  ;;  %v656_v22 = vrot.slane %v643_v21, %v655_v16 }
 0x190   : > { %2475 = vmatpush2.bf16.msra.mxu1 %v3828_v34  ;;  %v1689_v12 = vpop.f32.mrf.mxu0 }
 0x191   : > { %v1732_v43 = vpop.f32.mrf.mxu1  ;;  %v1690_v52 = vadd.f32 %v1689_v12, %v652_v45  ;;  %v1731_v55 = vadd.f32 %v1730_v13, %v1688_v48 }
 0x193   : > { %v1812_v54 = vpop.f32.mrf.mxu1  ;;  %v1733_v60 = vadd.f32 %v1732_v43, %v1690_v52 }
 0x195   : > { %v1814_v49 = vpop.f32.mrf.mxu1 }
 0x197   : > { %v1816_v57 = vpop.f32.mrf.mxu1 }
 0x199   : > { %v1818_v2 = vpop.f32.mrf.mxu1 }
 0x1ca   : > { %v1769_v50 = vpop.f32.mrf.mxu0 }
 0x1cb   : > { %v1770_v58 = vadd.f32 %v1769_v50, %v1727_v44 }
 0x1cc   : > { %v1771_v53 = vpop.f32.mrf.mxu0 }
 0x1cd   : > { %v1772_v56 = vadd.f32 %v1771_v53, %v1729_v51  ;;  %v1813_v3 = vadd.f32 %v1812_v54, %v1770_v58  ;;  %v3832_v58 = vld [vmem:[#allocation10 + $0x38] sm:$0xff]  }
 0x1ce   : > { %v1773_v59 = vpop.f32.mrf.mxu0 }
 0x1cf   : > { %v1774_v61 = vadd.f32 %v1773_v59, %v1731_v55  ;;  %v1815_v63 = vadd.f32 %v1814_v49, %v1772_v56  ;;  %v1993_v8 = vmax.f32 %v1813_v3, 0.0  ;;  %v3833_v59 = vld [vmem:[#allocation10 + $0x70] sm:$0xff]  }
 0x1d0   : > { %v1775_v62 = vpop.f32.mrf.mxu0  ;;  %v3841_v3 = vld [vmem:[#allocation10 + $0x50] sm:$0xff]  }
 0x1d1   : > { %v1817_v0 = vadd.f32 %v1816_v57, %v1774_v61  ;;  %v1776_v1 = vadd.f32 %v1775_v62, %v1733_v60  ;;  %v1994_v6 = vmax.f32 %v1815_v63, 0.0  ;;  %v3831_v57 = vld [vmem:[#allocation10 + $0x78] sm:$0xff]   ;;  %v3834_v60 = vld [vmem:[#allocation10 + $0x30] sm:$0xff]   ;;  %v3835_v61 = vld [vmem:[#allocation10 + $0x68] sm:$0xff]  }
 0x1d2   : > { %3277 = vmatprep.subr.bf16.mxu0 %v3831_v57  ;;  %v3836_v62 = vld [vmem:[#allocation10 + $0x28] sm:$0xff]   ;;  %v3837_v63 = vld [vmem:[#allocation10 + $0x60] sm:$0xff]   ;;  %v2787_v57 = vand.u32 127, %v645_v36 }
 0x1d3   : > { %v1819_v4 = vadd.f32 %v1818_v2, %v1776_v1  ;;  %v1997_v5 = vmax.f32 %v1817_v0, 0.0  ;;  %v1855_v11 = vpop.f32.mrf.mxu1  ;;  %v3838_v0 = vld [vmem:[#allocation10 + $0x20] sm:$0xff]   ;;  %v3839_v1 = vld [vmem:[#allocation10 + $0x58] sm:$0xff]  }
 0x1d4   : > { %v1856_v29 = vadd.f32 %v1855_v11, %v656_v22  ;;  %v3840_v2 = vld [vmem:[#allocation10 + $0x18] sm:$0xff]   ;;  %v3848_v11 = vld [vmem:[#allocation11 + $0x30] sm:$0xff]   ;;  %vm2788_vm2 = vcmp.lt.s32.totalorder %v2787_v57, 10 }
 0x1d5   : > { %v1998_v7 = vmax.f32 %v1819_v4, 0.0  ;;  %v2001_v10 = vpack.c.bf16 %v1997_v5, %v1993_v8  ;;  %v1857_v14 = vpop.f32.mrf.mxu1  ;;  %v3842_v4 = vld [vmem:[#allocation10 + $0x10] sm:$0xff]   ;;  %v3843_v5 = vld [vmem:[#allocation10 + $0x48] sm:$0xff]   ;;  %v3846_v8 = vld [vmem:[#allocation10] sm:$0xff]  }
 0x1d6   : > { %v1858_v28 = vadd.f32 %v1857_v14, %v660_v20  ;;  %v3849_v14 = vld [vmem:[#allocation11 + $0x28] sm:$0xff]  }
 0x1d7   : > { %v2002_v9 = vpack.c.bf16 %v1998_v7, %v1994_v6  ;;  %v1859_v18 = vpop.f32.mrf.mxu1  ;;  %v3844_v6 = vld [vmem:[#allocation10 + $0x8] sm:$0xff]   ;;  %v3845_v7 = vld [vmem:[#allocation10 + $0x40] sm:$0xff]  }
 0x1d8   : > { %v1860_v32 = vadd.f32 %v1859_v18, %v656_v22  ;;  %v2069_v18 = vld [vmem:[%s4474_s4] sm:$0x3] }
 0x1d9   : > { %2433 = vmatprep.mubr.bf16.mxu0 %v2002_v9  ;;  %v1861_v25 = vpop.f32.mrf.mxu1  ;;  %v3847_v9 = vld [vmem:[#allocation11 + $0x38] sm:$0xff]   ;;  %v2074_v22 = vrot.slane %v2069_v18, %v647_v41 }
 0x1da   : > { %2434 = vmatmul.mubr.bf16.vlgmr.msra.gmra.mxu0 %v2001_v10  ;;  %v1862_v39 = vadd.f32 %v1861_v25, %v660_v20  ;;  %v4114_v10 = vmov 0.0   ;;  %v2078_v20 = vrot.slane %v2069_v18, %v651_v40  ;;  %v3851_v41 = vld [vmem:[#allocation11 + $0x18] sm:$0xff]  }
 0x1db   : > { %3278 = vmatpush3.bf16.msra.mxu0 %v3832_v58  ;;  %3308 = vmatprep.subr.bf16.mxu1 %v4114_v10 }
 0x1dc   : > { %3279 = vmatprep.subr.bf16.mxu0 %v3833_v59 }
 0x1df   : > { %3280 = vmatpush3.bf16.msra.mxu0 %v3834_v60 }
 0x1e0   : > { %3281 = vmatprep.subr.bf16.mxu0 %v3835_v61 }
 0x1e3   : > { %3282 = vmatpush3.bf16.msra.mxu0 %v3836_v62 }
 0x1e4   : > { %3283 = vmatprep.subr.bf16.mxu0 %v3837_v63 }
 0x1e7   : > { %3284 = vmatpush3.bf16.msra.mxu0 %v3838_v0 }
 0x1e8   : > { %3285 = vmatprep.subr.bf16.mxu0 %v3839_v1 }
 0x1eb   : > { %3286 = vmatpush3.bf16.msra.mxu0 %v3840_v2 }
 0x1ec   : > { %3287 = vmatprep.subr.bf16.mxu0 %v3841_v3 }
 0x1ef   : > { %3288 = vmatpush3.bf16.msra.mxu0 %v3842_v4 }
 0x1f0   : > { %3289 = vmatprep.subr.bf16.mxu0 %v3843_v5 }
 0x1f3   : > { %3290 = vmatpush3.bf16.msra.mxu0 %v3844_v6 }
 0x1f4   : > { %3291 = vmatprep.subr.bf16.mxu0 %v3845_v7 }
 0x1f7   : > { %3292 = vmatpush3.bf16.msra.mxu0 %v3846_v8 }
 0x20a   : > { %v1898_v17 = vpop.f32.mrf.mxu0 }
 0x20b   : > { %v1899_v34 = vadd.f32 %v1898_v17, %v1856_v29 }
 0x20c   : > { %v1900_v19 = vpop.f32.mrf.mxu0 }
 0x20d   : > { %v1901_v33 = vadd.f32 %v1900_v19, %v1858_v28 }
 0x20e   : > { %v1902_v24 = vpop.f32.mrf.mxu0 }
 0x20f   : > { %v1903_v13 = vadd.f32 %v1902_v24, %v1860_v32 }
 0x210   : > { %v1904_v27 = vpop.f32.mrf.mxu0 }
 0x211   : > { %v1905_v23 = vadd.f32 %v1904_v27, %v1862_v39 }
 0x212   : > { %v1984_v31 = vpop.f32.mrf.mxu0 }
 0x213   : > { %v1941_v30 = vpop.f32.mrf.mxu1 }
 0x214   : > { %v1986_v37 = vpop.f32.mrf.mxu0  ;;  %v1942_v43 = vadd.f32 %v1941_v30, %v1899_v34 }
 0x215   : > { %v1943_v35 = vpop.f32.mrf.mxu1 }
 0x216   : > { %v1944_v42 = vadd.f32 %v1943_v35, %v1901_v33  ;;  %v1988_v26 = vpop.f32.mrf.mxu0  ;;  %v1985_v49 = vadd.f32 %v1984_v31, %v1942_v43 }
 0x217   : > { %v1945_v45 = vpop.f32.mrf.mxu1 }
 0x218   : > { %v1946_v21 = vadd.f32 %v1945_v45, %v1903_v13  ;;  %v1990_v46 = vpop.f32.mrf.mxu0  ;;  %v1987_v47 = vadd.f32 %v1986_v37, %v1944_v42  ;;  %v1995_v53 = vmax.f32 %v1985_v49, 0.0 }
 0x219   : > { %v1947_v54 = vpop.f32.mrf.mxu1 }
 0x21a   : > { %v1989_v12 = vadd.f32 %v1988_v26, %v1946_v21  ;;  %v1948_v48 = vadd.f32 %v1947_v54, %v1905_v23  ;;  %v1996_v52 = vmax.f32 %v1987_v47, 0.0  ;;  %v3852_v26 = vld [vmem:[#allocation11 + $0x10] sm:$0xff]   ;;  %v3853_v23 = vld [vmem:[#allocation11 + $0x8] sm:$0xff]   ;;  %v3854_v21 = vld [vmem:[#allocation11] sm:$0xff]  }
 0x21c   : > { %v1991_v50 = vadd.f32 %v1990_v46, %v1948_v48  ;;  %v1999_v51 = vmax.f32 %v1989_v12, 0.0  ;;  %v3236_v12 = vld [vmem:[%s4476_s6] ss:$0 sm:$0xff] }
 0x21e   : > { %v2000_v44 = vmax.f32 %v1991_v50, 0.0  ;;  %v2003_v56 = vpack.c.bf16 %v1999_v51, %v1995_v53 }
 0x220   : > { %v2004_v55 = vpack.c.bf16 %v2000_v44, %v1996_v52 }
 0x222   : > { %2476 = vmatprep.mubr.bf16.mxu1 %v2004_v55 }
 0x223   : > { %2477 = vmatmul.mubr.bf16.vlgmr.msra.gmra.mxu1 %v2003_v56  ;;  %v3253_v56 = vld [vmem:[%s4478_s8] ss:$0 sm:$0xff] }
 0x224   : > { %3309 = vmatpush3.bf16.msra.mxu1 %v3847_v9  ;;  %3324 = vmatprep.mubr.msk.bf16.mxu1 %vm4115_vm1, %v4114_v10 }
 0x225   : > { %3310 = vmatprep.subr.bf16.mxu1 %v4114_v10 }
 0x228   : > { %3311 = vmatpush3.bf16.msra.mxu1 %v3848_v11 }
 0x229   : > { %3312 = vmatprep.subr.bf16.mxu1 %v4114_v10 }
 0x22c   : > { %3313 = vmatpush3.bf16.msra.mxu1 %v3849_v14 }
 0x22d   : > { %3314 = vmatprep.subr.bf16.mxu1 %v4114_v10 }
 0x230   : > { %3315 = vmatpush3.bf16.msra.mxu1 %v3850_v15 }
 0x231   : > { %3316 = vmatprep.subr.bf16.mxu1 %v4114_v10 }
 0x234   : > { %3317 = vmatpush3.bf16.msra.mxu1 %v3851_v41 }
 0x235   : > { %3318 = vmatprep.subr.bf16.mxu1 %v4114_v10 }
 0x238   : > { %3319 = vmatpush3.bf16.msra.mxu1 %v3852_v26 }
 0x239   : > { %3320 = vmatprep.subr.bf16.mxu1 %v4114_v10 }
 0x23c   : > { %3321 = vmatpush3.bf16.msra.mxu1 %v3853_v23 }
 0x23d   : > { %3322 = vmatprep.subr.bf16.mxu1 %v4114_v10 }
 0x240   : > { %3323 = vmatpush3.bf16.msra.mxu1 %v3854_v21 }
 0x29a   : > { %v2435_v16 = vpop.f32.mrf.mxu0 }
 0x29b   : > { %v2436_v30 = vadd.f32 %v2435_v16, %v2074_v22 }
 0x29c   : > { %v2437_v17 = vpop.f32.mrf.mxu0 }
 0x29d   : > { %v2438_v28 = vadd.f32 %v2437_v17, %v2078_v20 }
 0x29e   : > { %v2439_v19 = vpop.f32.mrf.mxu0 }
 0x29f   : > { %v2440_v29 = vadd.f32 %v2439_v19, %v2074_v22 }
 0x2a0   : > { %v2441_v25 = vpop.f32.mrf.mxu0 }
 0x2a1   : > { %v2442_v32 = vadd.f32 %v2441_v25, %v2078_v20 }
 0x2e3   : > { %v2478_v24 = vpop.f32.mrf.mxu1 }
 0x2e4   : > { %v2479_v35 = vadd.f32 %v2478_v24, %v2436_v30 }
 0x2e5   : > { %v2480_v27 = vpop.f32.mrf.mxu1 }
 0x2e6   : > { %v2481_v33 = vadd.f32 %v2480_v27, %v2438_v28  ;;  %v2487_v40 = vmax.f32 %v2479_v35, 0.0 }
 0x2e7   : > { %v2482_v31 = vpop.f32.mrf.mxu1 }
 0x2e8   : > { %v2483_v34 = vadd.f32 %v2482_v31, %v2440_v29  ;;  %v2488_v42 = vmax.f32 %v2481_v33, 0.0 }
 0x2e9   : > { %v2484_v37 = vpop.f32.mrf.mxu1 }
 0x2ea   : > { %v2485_v39 = vadd.f32 %v2484_v37, %v2442_v32  ;;  %v2489_v13 = vmax.f32 %v2483_v34, 0.0 }
 0x2ec   : > { %v2490_v43 = vmax.f32 %v2485_v39, 0.0  ;;  %v2491_v38 = vpack.c.bf16 %v2489_v13, %v2487_v40 }
 0x2ee   : > { %v2492_v45 = vpack.c.bf16 %v2490_v43, %v2488_v42 }
 0x2f0   : > { %2660 = vmatprep.mubr.bf16.mxu0 %v2492_v45 }
 0x2f1   : > { %2661 = vmatmul.mubr.bf16.vlgmr.msra.gmra.mxu0 %v2491_v38 }
 0x3b1   : > { %v3293_v54 = vpop.f32.mrf.mxu0 }
 0x3b3   : > { %v3294_v46 = vpop.f32.mrf.mxu0 }
 0x3b4   : > { %v3295_v47 = vadd.f32 %v3294_v46, %v3293_v54 }
 0x3b5   : > { %v3296_v48 = vpop.f32.mrf.mxu0 }
 0x3b6   : > { %v2663_v50 = vadd.f32 %v3295_v47, %v3236_v12 }
 0x3b7   : > { %v3297_v49 = vpop.f32.mrf.mxu0 }
 0x3b8   : > { %v3298_v51 = vadd.f32 %v3297_v49, %v3296_v48  ;;  %v2669_v44 = vmax.f32 %v2663_v50, 0.0 }
 0x3ba   : > { %v2666_v52 = vadd.f32 %v3298_v51, %v3236_v12 }
 0x3bc   : > { %v2670_v53 = vmax.f32 %v2666_v52, 0.0 }
 0x3be   : > { %v2671_v55 = vpack.c.bf16 %v2670_v53, %v2669_v44 }
 0x3c0   : > { %3325 = vmatmul.mubr.bf16.vlgmr.msra.gmra.mxu1 %v2671_v55 }
 0x480   : > { %v2777_v58 = vpop.f32.mrf.mxu1 }
 0x481   : > { %v2778_v59 = vadd.f32 %v3253_v56, %v2777_v58 }
 0x482   : > { %v3326_v60 = vpop.f32.mrf.mxu1 }
 0x483   : > { %v2784_v61 = vmax.f32 %v2778_v59, 0.0 }
 0x484   : > { %v2780_v62 = vpop.f32.mrf.mxu1 }
 0x485   : > { %v2781_v63 = vadd.f32 %v3253_v56, %v2780_v62  ;;  %v2789_v0 = vsel %vm2788_vm2, %v2784_v61, -1e+30 }
 0x486   : > { %2791 = vmax.xlane.f32.xlu0 %v2789_v0  ;;  %v3327_v1 = vpop.f32.mrf.mxu1 }
 0x487   : > { %v2785_v2 = vmax.f32 %v2781_v63, 0.0 }
 0x489   : > { %v2790_v3 = vsel %vm2788_vm2, %v2785_v2, -1e+30 }
 0x48a   : > { %2793 = vmax.xlane.f32.xlu0 %v2790_v3 }
 0x50f   : > { %v2792_v4 = vpop.xlane.xlu0 %2791 }
 0x510   : > { %v2795_v5 = vsub.f32 %v2789_v0, %v2792_v4 }
 0x512   : > { %v2797_v6 = vmul.f32 1.442695, %v2795_v5 }
 0x513   : > { %v2794_v7 = vpop.xlane.xlu0 %2793 }
 0x514   : > { %3855 = vpow2.f32 %v2797_v6  ;;  %v2796_v36 = vsub.f32 %v2790_v3, %v2794_v7 }
 0x516   : > { %v2799_v8 = vmul.f32 1.442695, %v2796_v36 }
 0x518   : > { %3857 = vpow2.f32 %v2799_v8 }
 0x521   : > { %v3856_v9 = vpop.eup %3855 }
 0x522   : > { %2801 = vadd.xlane.f32.xlu1 %v3856_v9 }
 0x525   : > { %v3858_v10 = vpop.eup %3857 }
 0x526   : > { %2803 = vadd.xlane.f32.xlu1 %v3858_v10 }
 0x5ab   : > { %v2802_v11 = vpop.xlane.xlu1 %2801 }
 0x5ac   : > { %3859 = vrcp.f32 %v2802_v11 }
 0x5af   : > { %v2804_v14 = vpop.xlane.xlu1 %2803 }
 0x5b0   : > { %3861 = vrcp.f32 %v2804_v14 }
 0x5b9   : > { %v3860_v15 = vpop.eup %3859 }
 0x5ba   : > { %v2809_v17 = vmul.f32 %v3860_v15, %v3856_v9 }
 0x5bd   : > { %v3862_v16 = vpop.eup %3861 }
 0x5be   : > { %v2810_v18 = vmul.f32 %v3862_v16, %v3858_v10 }
 0x5c0   : > { %v3275_v19 = vpack.c.bf16 %v2810_v18, %v2809_v17 }
 0x5c2   : > { %3276 = vst [vmem:[%s422_s2] sm:$0xff] %v3275_v19  }
 0x5c3   : > { %4034 = shalt.err (!%p4031_p3)
}
 0x5c4   : > { %s4035_s23 = scalar_lea.hbm %s4425_s20, 128  ;;  %s4039_s21 = scalar_lea.hbm %s4479_s9, 256 }
 0x5c5   : > { %p4036_p10 = scmp.ne.s32.totalorder %s4425_s20, %s4035_s23  ;;  %p4040_p13 = scmp.lt.s32.totalorder %s4425_s20, %s4479_s9 }
 0x5c6   : > { %p4041_p0 = scmp.lt.s32.totalorder %s4039_s21, %s4035_s23 }
 0x5c7   : > { %p4037_p6 = pnand %p4036_p10, %p4505_p9 }
 0x5c8   : > { %p4042_p2 = por %p4041_p0, %p4040_p13 }
 0x5c9   : > { %p4038_p12 = pneg %p4037_p6 }
 0x5cb   : > { %p4043_p8 = pnand %p4042_p2, %p4038_p12 }
 0x5cd   : > { %4046 = shalt.err (!%p4043_p8)
}
 0x5ce   : > { %s4117_s3 = smov 64   ;;  %s4118_s14 = smov 4  }
 0x5cf   : > { %3353 = dma.vmem_to_hbm [thread:$0]  (%p4505_p9), %s4427_s1, 128, %s4425_s20, %s2822_s28, %s4117_s3, %s4117_s3, %s4118_s14  }
 0x5d0 PF: > { %s2850_s16 = sand.u32 1, %s4085_s30   ;;  %p4506_p4 = scmp.ne.s32.totalorder %s4495_s29, 0 }
 0x5d1   : > { %p4507_p11 = scmp.ge.s32.totalorder %s4097_s12, 2  ;;  %s2851_s15 = scalar_lea.sflag [#allocation4], %s2850_s16 }
 0x5d3   : > { %p3376_p7 = pnand %p4507_p11, %p4506_p4 }
 0x5d5   : > { %p3377_p5 = pneg %p3376_p7 }
 0x5d7   : > { %4080 = dma.done.wait (%p3377_p5), %s2851_s15, 128  }
 0x5d8   : > { %4082 = vsyncadd (%p3377_p5), %s2851_s15, 4294967168  ;;  %p25_p1 = scmp.ge.s32.totalorder %s4261_s19, 4   ;;  %s4508_s30 = smov %s4089_s10 }
 0x5d9   : > { %s4509_s10 = smov %s4093_s11  ;;  %s4510_s11 = smov %s4273_s18 }
 0x5da   : > { %s4511_s12 = smov %s4261_s19  ;;  %27 = sbr.rel (!%p25_p1) target bundleno = 12 (0xc), region = 121 }
 0x5df   :  { %2856 = vsyncpa [#allocation3], 1 }
 0x5e0   :  { %2858 = vsyncpa [#allocation3 + $0x1], 1 }
 0x5e1   :  { %2859 = vsyncpa [#allocation6], 1 }
 0x5e2   :  { %2860 = vsyncpa [#allocation9], 1 }
 0x5e3   :  { %2861 = vsyncpa [#allocation12], 1 }
 0x5e4   :  { %2862 = vsyncpa [#allocation4], 1 }
 0x5e5   :  { %2864 = vsyncpa [#allocation4 + $0x1], 1 }

</bundles_post_ra>
